<compile_context>
chip_gen: v7x
topology: tpu7x:2x2x1
jax: 0.10.0
libtpu: 0.0.40
codegen_flags: <defaults>
</compile_context>

<pallas_src>
import functools
import math

import jax
import jax.numpy as jnp
from jax import lax
from jax.experimental import pallas as pl
from jax.experimental.pallas import tpu as pltpu


# ----------------------------- small helpers --------------------------------

def _layer_norm(v, g, b, eps=1e-5):
    mu = jnp.mean(v, axis=-1, keepdims=True)
    var = jnp.mean((v - mu) ** 2, axis=-1, keepdims=True)
    return (v - mu) * lax.rsqrt(var + eps) * g + b


def _mish(x):
    # mish(x) = x * tanh(softplus(x));  tanh(log(u)) = (u^2-1)/(u^2+1), u = 1+e^x.
    # One exp + one approx reciprocal instead of exp + log1p + tanh.
    u = 1.0 + jnp.exp(jnp.minimum(x, 20.0))     # clamp: tanh(softplus(20)) == 1
    u2 = u * u
    return x * ((u2 - 1.0) * pl.reciprocal(u2 + 1.0, approx=True))


# ------------------------------- the kernel ----------------------------------

def transformer_block_kernel(x_ref,
                             ln1_g_ref, ln1_b_ref,
                             wq_ref, wk_ref, wv_ref,
                             wproj_ref, bproj_ref,
                             ln2_g_ref, ln2_b_ref,
                             w1_ref, b1_ref, w2_ref, b2_ref,
                             out_ref,
                             k_scr, v_scr, q_scr,
                             *, n_head, q_tile):
    qi = pl.program_id(1)
    T = x_ref.shape[1]
    C = x_ref.shape[2]
    hs = C // n_head
    scale = hs ** -0.5
    n_chunks = T // q_tile

    ln1_g = ln1_g_ref[...]            # (1, C) f32, broadcasts over rows
    ln1_b = ln1_b_ref[...]

    # ---- once per batch element: K/V for the full sequence, head-major ------
    # Chunked (q_tile rows at a time) so only one (q_tile, C) f32 temporary is
    # live; the head split is fused into the scratch store (static lane slices
    # written straight into the (H, T, hs) buffers - no stack / concat).
    @pl.when(qi == 0)
    def _():
        def chunk_body(c, carry):
            r0 = pl.multiple_of(c * q_tile, q_tile)
            xc = _layer_norm(x_ref[0, pl.ds(r0, q_tile), :], ln1_g, ln1_b)
            xc = xc.astype(jnp.bfloat16)
            kc = jnp.dot(xc, wk_ref[...],
                         preferred_element_type=jnp.float32).astype(jnp.bfloat16)
            vc = jnp.dot(xc, wv_ref[...],
                         preferred_element_type=jnp.float32).astype(jnp.bfloat16)
            for h in range(n_head):
                k_scr[h, pl.ds(r0, q_tile), :] = kc[:, h * hs:(h + 1) * hs]
                v_scr[h, pl.ds(r0, q_tile), :] = vc[:, h * hs:(h + 1) * hs]
            return carry

        lax.fori_loop(0, n_chunks, chunk_body, 0)

    # ---- per q-tile: attention + projection + FFN (bf16 MXU, f32 accum) -----
    row0 = pl.multiple_of(qi * q_tile, q_tile)
    x_tile = x_ref[0, pl.ds(row0, q_tile), :]                      # (Tq, C) f32

    xn_q = _layer_norm(x_tile, ln1_g, ln1_b).astype(jnp.bfloat16)
    # One full-width (Tq, C) x (C, C) matmul; 1/sqrt(hs) folded in here (this
    # tensor is T/hs times smaller than the score block).
    q2 = (jnp.dot(xn_q, wq_ref[...], preferred_element_type=jnp.float32)
          * scale).astype(jnp.bfloat16)
    for h in range(n_head):
        q_scr[h, :, :] = q2[:, h * hs:(h + 1) * hs]

    # Batched attention over all heads: one scores einsum + one PV einsum.
    s = jnp.einsum('hqd,hkd->hqk', q_scr[...], k_scr[...],
                   preferred_element_type=jnp.float32)             # (H, Tq, T) f32
    m = jnp.max(s, axis=-1, keepdims=True)
    e = jnp.exp(s - m)
    inv = pl.reciprocal(jnp.sum(e, axis=-1, keepdims=True), approx=True)
    p = (e * inv).astype(jnp.bfloat16)                             # bf16 probs
    o = jnp.einsum('hqk,hkd->hqd', p, v_scr[...],
                   preferred_element_type=jnp.float32)             # (H, Tq, hs)

    # Head merge folded into the (H, hs, C) projection weight: batched matmul
    # per head + leading-axis sum (no concatenate).
    attn = jnp.sum(
        jnp.einsum('hqd,hdc->hqc', o.astype(jnp.bfloat16), wproj_ref[...],
                   preferred_element_type=jnp.float32),
        axis=0) + bproj_ref[...]
    x1 = x_tile + attn

    # ---- x + ffwd(ln2(x)) ----------------------------------------------------
    xn2 = _layer_norm(x1, ln2_g_ref[...], ln2_b_ref[...]).astype(jnp.bfloat16)
    h1 = jnp.dot(xn2, w1_ref[...], preferred_element_type=jnp.float32) + b1_ref[...]
    h1 = _mish(h1)
    y = jnp.dot(h1.astype(jnp.bfloat16), w2_ref[...],
                preferred_element_type=jnp.float32) + b2_ref[...]
    out_ref[0] = x1 + y


# ------------------------------- the wrapper ---------------------------------

def _device_kind():
    try:
        return jax.devices()[0].device_kind.lower()
    except Exception:
        return ""


def _pick_q_tile(T):
    """Largest divisor of T that is a multiple of 8, capped at 128 (256 on v6e)."""
    cap = 256 if "v6" in _device_kind() else 128
    best, t = 0, 8
    while t <= min(T, cap):
        if T % t == 0:
            best = t
        t += 8
    return best if best > 0 else T


def _vmem_limit_bytes(T, C, q_tile, n_head):
    """Scoped-VMEM request derived from the actual footprint, capped per chip
    generation (v7x only has 64 MiB of physical VMEM)."""
    hs = C // n_head
    weights = 12 * C * C * 2                      # resident bf16 qkv/proj/ffn weights
    kv_scr = 2 * n_head * T * hs * 2              # bf16 K/V caches
    qh_scr = n_head * q_tile * hs * 2
    x_blk = 2 * T * C * 4                         # double-buffered full-seq x (f32)
    out_blk = 2 * q_tile * C * 4
    live = (2 * n_head * q_tile * T * 4           # f32 scores + exp
            + 2 * q_tile * 4 * C * 4)             # f32 FFN hidden + mish temps
    need = weights + kv_scr + qh_scr + x_blk + out_blk + live
    cap = (56 << 20) if "v7" in _device_kind() else (100 << 20)
    return int(max(min(int(need * 1.5) + (8 << 20), cap), 32 << 20))


def transformer_block(x, params, n_head, q_tile=None):
    B, T, C = x.shape
    assert C % n_head == 0
    hs = C // n_head
    if q_tile is None:
        q_tile = _pick_q_tile(T)
    assert T % q_tile == 0

    (ln1_g, ln1_b, wq, wk, wv, wproj, bproj,
     ln2_g, ln2_b, w1, b1, w2, b2) = params

    bf16 = lambda w: w.astype(jnp.bfloat16)
    # Head merge folded into the projection weight layout: (C, C) -> (H, hs, C).
    wproj_h = bf16(wproj).reshape(n_head, hs, C)

    args = (x,
            ln1_g, ln1_b,
            bf16(wq), bf16(wk), bf16(wv),
            wproj_h, bproj,
            ln2_g, ln2_b,
            bf16(w1), b1, bf16(w2), b2)

    # Weights / biases / LN params: whole array resident in VMEM (single copy,
    # never re-DMA'd / double-buffered by the pipeline).
    resident = pl.BlockSpec(memory_space=pltpu.MemorySpace.VMEM)
    # Full-sequence x view: its block index depends only on b, so the pipeline
    # keeps one buffer per batch element and re-uses it across all q-tiles.
    in_specs = ([pl.BlockSpec((1, T, C), lambda b, qi: (b, 0, 0))]
                + [resident] * 13)
    out_specs = pl.BlockSpec((1, q_tile, C), lambda b, qi: (b, qi, 0))

    kernel = functools.partial(transformer_block_kernel,
                               n_head=n_head, q_tile=q_tile)

    flops = B * (24 * T * C * C + 4 * T * T * C)
    transcendentals = B * (n_head * T * T + 4 * T * C)
    bytes_accessed = 2 * B * T * C * 4 + 12 * C * C * 2 + 14 * C * 4

    return pl.pallas_call(
        kernel,
        out_shape=jax.ShapeDtypeStruct((B, T, C), jnp.float32),
        grid=(B, T // q_tile),
        in_specs=in_specs,
        out_specs=out_specs,
        scratch_shapes=[
            pltpu.VMEM((n_head, T, hs), jnp.bfloat16),        # K cache (head-major)
            pltpu.VMEM((n_head, T, hs), jnp.bfloat16),        # V cache (head-major)
            pltpu.VMEM((n_head, q_tile, hs), jnp.bfloat16),   # Q tile (head-major)
        ],
        compiler_params=pltpu.CompilerParams(
            # B is megacore-parallel; the q-tile axis must stay "arbitrary":
            # K/V scratch is filled at qi == 0 and re-used by later q-tiles of
            # the same batch element.
            dimension_semantics=("parallel", "arbitrary"),
            vmem_limit_bytes=_vmem_limit_bytes(T, C, q_tile, n_head)),
        cost_estimate=pl.CostEstimate(flops=int(flops),
                                      transcendentals=int(transcendentals),
                                      bytes_accessed=int(bytes_accessed)),
    )(*args)


# ------------------------- params / pure-JAX reference -----------------------

def init_params(key, C, n_head):
    H = 4 * C
    ks = jax.random.split(key, 8)
    s = 1.0 / math.sqrt(C)
    wq = jax.random.normal(ks[0], (C, C), jnp.float32) * s
    wk = jax.random.normal(ks[1], (C, C), jnp.float32) * s
    wv = jax.random.normal(ks[2], (C, C), jnp.float32) * s
    wproj = jax.random.normal(ks[3], (C, C), jnp.float32) * s
    bproj = jax.random.normal(ks[4], (1, C), jnp.float32) * 0.02
    w1 = jax.random.normal(ks[5], (C, H), jnp.float32) * s
    b1 = jax.random.normal(ks[6], (1, H), jnp.float32) * 0.02
    w2 = jax.random.normal(ks[7], (H, C), jnp.float32) * (1.0 / math.sqrt(H))
    b2 = jnp.zeros((1, C), jnp.float32)
    ln1_g = jnp.ones((1, C), jnp.float32)
    ln1_b = jnp.zeros((1, C), jnp.float32)
    ln2_g = jnp.ones((1, C), jnp.float32)
    ln2_b = jnp.zeros((1, C), jnp.float32)
    return (ln1_g, ln1_b, wq, wk, wv, wproj, bproj,
            ln2_g, ln2_b, w1, b1, w2, b2)


def reference(x, params, n_head):
    # Pure-JAX fp32 reference matching the PyTorch module's forward (eval mode).
    (ln1_g, ln1_b, wq, wk, wv, wproj, bproj,
     ln2_g, ln2_b, w1, b1, w2, b2) = params
    B, T, C = x.shape
    hs = C // n_head
    xn = _layer_norm(x, ln1_g[0], ln1_b[0])
    q = (xn @ wq).reshape(B, T, n_head, hs).transpose(0, 2, 1, 3)
    k = (xn @ wk).reshape(B, T, n_head, hs).transpose(0, 2, 1, 3)
    v = (xn @ wv).reshape(B, T, n_head, hs).transpose(0, 2, 1, 3)
    wei = jnp.einsum('bhqd,bhkd->bhqk', q, k) * hs ** -0.5
    wei = jax.nn.softmax(wei, axis=-1)
    o = jnp.einsum('bhqk,bhkd->bhqd', wei, v)
    o = o.transpose(0, 2, 1, 3).reshape(B, T, C)
    x1 = x + (o @ wproj + bproj[0])
    xn2 = _layer_norm(x1, ln2_g[0], ln2_b[0])
    h1 = xn2 @ w1 + b1[0]
    h1 = h1 * jnp.tanh(jax.nn.softplus(h1))
    return x1 + (h1 @ w2 + b2[0])


if __name__ == "__main__":
    B, T, C, n_head = 2, 8, 32, 4
    key = jax.random.PRNGKey(0)
    kx, kp = jax.random.split(key)
    x = jax.random.normal(kx, (B, T, C), jnp.float32)
    params = init_params(kp, C, n_head)

    out = jax.block_until_ready(transformer_block(x, params, n_head))

    ref = reference(x, params, n_head)
    err = jnp.max(jnp.abs(out - ref))
    # Tolerance accounts for bf16 MXU operands + approx reciprocals (softmax/Mish).
    assert jnp.allclose(out, ref, atol=5e-2, rtol=5e-2), f"max err {err}"
    print("KERNEL_OK")
</pallas_src>

<mosaic_0001>
module attributes {stable_mosaic.version = 11 : i64} {
  func.func @transformer_block_kernel(%arg0: i32, %arg1: i32, %arg2: memref<1x8x32xf32, #tpu.memory_space<vmem>>, %arg3: memref<1x32xf32, #tpu.memory_space<vmem>>, %arg4: memref<1x32xf32, #tpu.memory_space<vmem>>, %arg5: memref<32x32xbf16, #tpu.memory_space<vmem>>, %arg6: memref<32x32xbf16, #tpu.memory_space<vmem>>, %arg7: memref<32x32xbf16, #tpu.memory_space<vmem>>, %arg8: memref<4x8x32xbf16, #tpu.memory_space<vmem>>, %arg9: memref<1x32xf32, #tpu.memory_space<vmem>>, %arg10: memref<1x32xf32, #tpu.memory_space<vmem>>, %arg11: memref<1x32xf32, #tpu.memory_space<vmem>>, %arg12: memref<32x128xbf16, #tpu.memory_space<vmem>>, %arg13: memref<1x128xf32, #tpu.memory_space<vmem>>, %arg14: memref<128x32xbf16, #tpu.memory_space<vmem>>, %arg15: memref<1x32xf32, #tpu.memory_space<vmem>>, %arg16: memref<1x8x32xf32, #tpu.memory_space<vmem>>, %arg17: memref<4x8x8xbf16, #tpu.memory_space<vmem>>, %arg18: memref<4x8x8xbf16, #tpu.memory_space<vmem>>, %arg19: memref<4x8x8xbf16, #tpu.memory_space<vmem>>) attributes {dimension_semantics = [#tpu.dimension_semantics<parallel>, #tpu.dimension_semantics<arbitrary>], iteration_bounds = array<i64: 2, 1>, scalar_prefetch = 0 : i64, scratch_operands = 3 : i64, tpu.core_type = #tpu.core_type<tc>, window_params = [{transform_indices = @transform_0, window_bounds = array<i64: 1, 8, 32>}, {pipeline_mode = #tpu.pipeline_mode<synchronous>, transform_indices = @transform_1, window_bounds = array<i64: 1, 32>}, {pipeline_mode = #tpu.pipeline_mode<synchronous>, transform_indices = @transform_2, window_bounds = array<i64: 1, 32>}, {pipeline_mode = #tpu.pipeline_mode<synchronous>, transform_indices = @transform_3, window_bounds = array<i64: 32, 32>}, {pipeline_mode = #tpu.pipeline_mode<synchronous>, transform_indices = @transform_4, window_bounds = array<i64: 32, 32>}, {pipeline_mode = #tpu.pipeline_mode<synchronous>, transform_indices = @transform_5, window_bounds = array<i64: 32, 32>}, {pipeline_mode = #tpu.pipeline_mode<synchronous>, transform_indices = @transform_6, window_bounds = array<i64: 4, 8, 32>}, {pipeline_mode = #tpu.pipeline_mode<synchronous>, transform_indices = @transform_7, window_bounds = array<i64: 1, 32>}, {pipeline_mode = #tpu.pipeline_mode<synchronous>, transform_indices = @transform_8, window_bounds = array<i64: 1, 32>}, {pipeline_mode = #tpu.pipeline_mode<synchronous>, transform_indices = @transform_9, window_bounds = array<i64: 1, 32>}, {pipeline_mode = #tpu.pipeline_mode<synchronous>, transform_indices = @transform_10, window_bounds = array<i64: 32, 128>}, {pipeline_mode = #tpu.pipeline_mode<synchronous>, transform_indices = @transform_11, window_bounds = array<i64: 1, 128>}, {pipeline_mode = #tpu.pipeline_mode<synchronous>, transform_indices = @transform_12, window_bounds = array<i64: 128, 32>}, {pipeline_mode = #tpu.pipeline_mode<synchronous>, transform_indices = @transform_13, window_bounds = array<i64: 1, 32>}, {transform_indices = @transform_14, window_bounds = array<i64: 1, 8, 32>}]} {
    %c0 = arith.constant 0 : index
    %c0_0 = arith.constant 0 : index
    %0 = vector.load %arg3[%c0, %c0_0] : memref<1x32xf32, #tpu.memory_space<vmem>>, vector<1x32xf32>
    %c0_1 = arith.constant 0 : index
    %c0_2 = arith.constant 0 : index
    %1 = vector.load %arg4[%c0_1, %c0_2] : memref<1x32xf32, #tpu.memory_space<vmem>>, vector<1x32xf32>
    %c0_i32 = arith.constant 0 : i32
    %2 = arith.cmpi eq, %arg1, %c0_i32 : i32
    %3 = arith.extui %2 : i1 to i32
    %c0_i32_3 = arith.constant 0 : i32
    %4 = arith.cmpi ne, %3, %c0_i32_3 : i32
    scf.if %4 {
      %c0_i32_69 = arith.constant 0 : i32
      %c8_i32_70 = arith.constant 8 : i32
      %131 = arith.muli %c0_i32_69, %c8_i32_70 : i32
      %132 = tpu.assume_multiple %131, 8 : i32
      %c0_71 = arith.constant 0 : index
      %133 = arith.index_cast %132 : i32 to index
      %c0_72 = arith.constant 0 : index
      %134 = vector.load %arg2[%c0_71, %133, %c0_72] : memref<1x8x32xf32, #tpu.memory_space<vmem>>, vector<1x8x32xf32>
      %135 = vector.shape_cast %134 : vector<1x8x32xf32> to vector<8x32xf32>
      %cst_73 = arith.constant dense<0.000000e+00> : vector<8xf32>
      %136 = vector.multi_reduction <add>, %135, %cst_73 [1] : vector<8x32xf32> to vector<8xf32>
      %137 = vector.shape_cast %136 : vector<8xf32> to vector<8x1xf32>
      %cst_74 = arith.constant 3.200000e+01 : f32
      %138 = vector.broadcast %cst_74 : f32 to vector<8x1xf32>
      %139 = arith.divf %137, %138 : vector<8x1xf32>
      %140 = vector.broadcast %139 : vector<8x1xf32> to vector<8x32xf32>
      %141 = arith.subf %135, %140 : vector<8x32xf32>
      %142 = arith.mulf %141, %141 : vector<8x32xf32>
      %cst_75 = arith.constant dense<0.000000e+00> : vector<8xf32>
      %143 = vector.multi_reduction <add>, %142, %cst_75 [1] : vector<8x32xf32> to vector<8xf32>
      %144 = vector.shape_cast %143 : vector<8xf32> to vector<8x1xf32>
      %cst_76 = arith.constant 3.200000e+01 : f32
      %145 = vector.broadcast %cst_76 : f32 to vector<8x1xf32>
      %146 = arith.divf %144, %145 : vector<8x1xf32>
      %147 = vector.broadcast %139 : vector<8x1xf32> to vector<8x32xf32>
      %148 = arith.subf %135, %147 : vector<8x32xf32>
      %cst_77 = arith.constant 9.99999974E-6 : f32
      %149 = vector.broadcast %cst_77 : f32 to vector<8x1xf32>
      %150 = arith.addf %146, %149 : vector<8x1xf32>
      %151 = math.rsqrt %150 : vector<8x1xf32>
      %152 = vector.broadcast %151 : vector<8x1xf32> to vector<8x32xf32>
      %153 = arith.mulf %148, %152 : vector<8x32xf32>
      %154 = vector.broadcast %0 : vector<1x32xf32> to vector<8x32xf32>
      %155 = arith.mulf %153, %154 : vector<8x32xf32>
      %156 = vector.broadcast %1 : vector<1x32xf32> to vector<8x32xf32>
      %157 = arith.addf %155, %156 : vector<8x32xf32>
      %158 = arith.truncf %157 : vector<8x32xf32> to vector<8x32xbf16>
      %c0_78 = arith.constant 0 : index
      %c0_79 = arith.constant 0 : index
      %159 = vector.load %arg6[%c0_78, %c0_79] : memref<32x32xbf16, #tpu.memory_space<vmem>>, vector<32x32xbf16>
      %cst_80 = arith.constant dense<0.000000e+00> : vector<8x32xf32>
      %160 = tpu.matmul %158, %159, %cst_80 {dimension_numbers = #tpu.dot_dimension_numbers<[1], [0], [0], [1], [0, 0, 1, 1], [], []>} : vector<8x32xbf16>, vector<32x32xbf16>, vector<8x32xf32> -> vector<8x32xf32>
      %161 = arith.truncf %160 : vector<8x32xf32> to vector<8x32xbf16>
      %c0_81 = arith.constant 0 : index
      %c0_82 = arith.constant 0 : index
      %162 = vector.load %arg7[%c0_81, %c0_82] : memref<32x32xbf16, #tpu.memory_space<vmem>>, vector<32x32xbf16>
      %cst_83 = arith.constant dense<0.000000e+00> : vector<8x32xf32>
      %163 = tpu.matmul %158, %162, %cst_83 {dimension_numbers = #tpu.dot_dimension_numbers<[1], [0], [0], [1], [0, 0, 1, 1], [], []>} : vector<8x32xbf16>, vector<32x32xbf16>, vector<8x32xf32> -> vector<8x32xf32>
      %164 = arith.truncf %163 : vector<8x32xf32> to vector<8x32xbf16>
      %165 = vector.extract_strided_slice %161 {offsets = [0, 0], sizes = [8, 8], strides = [1, 1]} : vector<8x32xbf16> to vector<8x8xbf16>
      %c0_84 = arith.constant 0 : index
      %166 = arith.index_cast %132 : i32 to index
      %c0_85 = arith.constant 0 : index
      %167 = vector.load %arg17[%c0_84, %166, %c0_85] : memref<4x8x8xbf16, #tpu.memory_space<vmem>>, vector<1x8x8xbf16>
      %168 = vector.shape_cast %167 : vector<1x8x8xbf16> to vector<8x8xbf16>
      %169 = vector.shape_cast %165 : vector<8x8xbf16> to vector<1x8x8xbf16>
      tpu.vector_store %arg17[%c0_84, %166, %c0_85], %169 {strides = array<i32>} : memref<4x8x8xbf16, #tpu.memory_space<vmem>>, vector<1x8x8xbf16>,
      %170 = vector.extract_strided_slice %164 {offsets = [0, 0], sizes = [8, 8], strides = [1, 1]} : vector<8x32xbf16> to vector<8x8xbf16>
      %c0_86 = arith.constant 0 : index
      %171 = arith.index_cast %132 : i32 to index
      %c0_87 = arith.constant 0 : index
      %172 = vector.load %arg18[%c0_86, %171, %c0_87] : memref<4x8x8xbf16, #tpu.memory_space<vmem>>, vector<1x8x8xbf16>
      %173 = vector.shape_cast %172 : vector<1x8x8xbf16> to vector<8x8xbf16>
      %174 = vector.shape_cast %170 : vector<8x8xbf16> to vector<1x8x8xbf16>
      tpu.vector_store %arg18[%c0_86, %171, %c0_87], %174 {strides = array<i32>} : memref<4x8x8xbf16, #tpu.memory_space<vmem>>, vector<1x8x8xbf16>,
      %175 = vector.extract_strided_slice %161 {offsets = [0, 8], sizes = [8, 8], strides = [1, 1]} : vector<8x32xbf16> to vector<8x8xbf16>
      %c1_88 = arith.constant 1 : index
      %176 = arith.index_cast %132 : i32 to index
      %c0_89 = arith.constant 0 : index
      %177 = vector.load %arg17[%c1_88, %176, %c0_89] : memref<4x8x8xbf16, #tpu.memory_space<vmem>>, vector<1x8x8xbf16>
      %178 = vector.shape_cast %177 : vector<1x8x8xbf16> to vector<8x8xbf16>
      %179 = vector.shape_cast %175 : vector<8x8xbf16> to vector<1x8x8xbf16>
      tpu.vector_store %arg17[%c1_88, %176, %c0_89], %179 {strides = array<i32>} : memref<4x8x8xbf16, #tpu.memory_space<vmem>>, vector<1x8x8xbf16>,
      %180 = vector.extract_strided_slice %164 {offsets = [0, 8], sizes = [8, 8], strides = [1, 1]} : vector<8x32xbf16> to vector<8x8xbf16>
      %c1_90 = arith.constant 1 : index
      %181 = arith.index_cast %132 : i32 to index
      %c0_91 = arith.constant 0 : index
      %182 = vector.load %arg18[%c1_90, %181, %c0_91] : memref<4x8x8xbf16, #tpu.memory_space<vmem>>, vector<1x8x8xbf16>
      %183 = vector.shape_cast %182 : vector<1x8x8xbf16> to vector<8x8xbf16>
      %184 = vector.shape_cast %180 : vector<8x8xbf16> to vector<1x8x8xbf16>
      tpu.vector_store %arg18[%c1_90, %181, %c0_91], %184 {strides = array<i32>} : memref<4x8x8xbf16, #tpu.memory_space<vmem>>, vector<1x8x8xbf16>,
      %185 = vector.extract_strided_slice %161 {offsets = [0, 16], sizes = [8, 8], strides = [1, 1]} : vector<8x32xbf16> to vector<8x8xbf16>
      %c2_92 = arith.constant 2 : index
      %186 = arith.index_cast %132 : i32 to index
      %c0_93 = arith.constant 0 : index
      %187 = vector.load %arg17[%c2_92, %186, %c0_93] : memref<4x8x8xbf16, #tpu.memory_space<vmem>>, vector<1x8x8xbf16>
      %188 = vector.shape_cast %187 : vector<1x8x8xbf16> to vector<8x8xbf16>
      %189 = vector.shape_cast %185 : vector<8x8xbf16> to vector<1x8x8xbf16>
      tpu.vector_store %arg17[%c2_92, %186, %c0_93], %189 {strides = array<i32>} : memref<4x8x8xbf16, #tpu.memory_space<vmem>>, vector<1x8x8xbf16>,
      %190 = vector.extract_strided_slice %164 {offsets = [0, 16], sizes = [8, 8], strides = [1, 1]} : vector<8x32xbf16> to vector<8x8xbf16>
      %c2_94 = arith.constant 2 : index
      %191 = arith.index_cast %132 : i32 to index
      %c0_95 = arith.constant 0 : index
      %192 = vector.load %arg18[%c2_94, %191, %c0_95] : memref<4x8x8xbf16, #tpu.memory_space<vmem>>, vector<1x8x8xbf16>
      %193 = vector.shape_cast %192 : vector<1x8x8xbf16> to vector<8x8xbf16>
      %194 = vector.shape_cast %190 : vector<8x8xbf16> to vector<1x8x8xbf16>
      tpu.vector_store %arg18[%c2_94, %191, %c0_95], %194 {strides = array<i32>} : memref<4x8x8xbf16, #tpu.memory_space<vmem>>, vector<1x8x8xbf16>,
      %195 = vector.extract_strided_slice %161 {offsets = [0, 24], sizes = [8, 8], strides = [1, 1]} : vector<8x32xbf16> to vector<8x8xbf16>
      %c3_96 = arith.constant 3 : index
      %196 = arith.index_cast %132 : i32 to index
      %c0_97 = arith.constant 0 : index
      %197 = vector.load %arg17[%c3_96, %196, %c0_97] : memref<4x8x8xbf16, #tpu.memory_space<vmem>>, vector<1x8x8xbf16>
      %198 = vector.shape_cast %197 : vector<1x8x8xbf16> to vector<8x8xbf16>
      %199 = vector.shape_cast %195 : vector<8x8xbf16> to vector<1x8x8xbf16>
      tpu.vector_store %arg17[%c3_96, %196, %c0_97], %199 {strides = array<i32>} : memref<4x8x8xbf16, #tpu.memory_space<vmem>>, vector<1x8x8xbf16>,
      %200 = vector.extract_strided_slice %164 {offsets = [0, 24], sizes = [8, 8], strides = [1, 1]} : vector<8x32xbf16> to vector<8x8xbf16>
      %c3_98 = arith.constant 3 : index
      %201 = arith.index_cast %132 : i32 to index
      %c0_99 = arith.constant 0 : index
      %202 = vector.load %arg18[%c3_98, %201, %c0_99] : memref<4x8x8xbf16, #tpu.memory_space<vmem>>, vector<1x8x8xbf16>
      %203 = vector.shape_cast %202 : vector<1x8x8xbf16> to vector<8x8xbf16>
      %204 = vector.shape_cast %200 : vector<8x8xbf16> to vector<1x8x8xbf16>
      tpu.vector_store %arg18[%c3_98, %201, %c0_99], %204 {strides = array<i32>} : memref<4x8x8xbf16, #tpu.memory_space<vmem>>, vector<1x8x8xbf16>,
      %c1_i32 = arith.constant 1 : i32
    } else {
    }
    %c8_i32 = arith.constant 8 : i32
    %5 = arith.muli %arg1, %c8_i32 : i32
    %6 = tpu.assume_multiple %5, 8 : i32
    %c0_4 = arith.constant 0 : index
    %7 = arith.index_cast %6 : i32 to index
    %c0_5 = arith.constant 0 : index
    %8 = vector.load %arg2[%c0_4, %7, %c0_5] : memref<1x8x32xf32, #tpu.memory_space<vmem>>, vector<1x8x32xf32>
    %9 = vector.shape_cast %8 : vector<1x8x32xf32> to vector<8x32xf32>
    %cst = arith.constant dense<0.000000e+00> : vector<8xf32>
    %10 = vector.multi_reduction <add>, %9, %cst [1] : vector<8x32xf32> to vector<8xf32>
    %11 = vector.shape_cast %10 : vector<8xf32> to vector<8x1xf32>
    %cst_6 = arith.constant 3.200000e+01 : f32
    %12 = vector.broadcast %cst_6 : f32 to vector<8x1xf32>
    %13 = arith.divf %11, %12 : vector<8x1xf32>
    %14 = vector.broadcast %13 : vector<8x1xf32> to vector<8x32xf32>
    %15 = arith.subf %9, %14 : vector<8x32xf32>
    %16 = arith.mulf %15, %15 : vector<8x32xf32>
    %cst_7 = arith.constant dense<0.000000e+00> : vector<8xf32>
    %17 = vector.multi_reduction <add>, %16, %cst_7 [1] : vector<8x32xf32> to vector<8xf32>
    %18 = vector.shape_cast %17 : vector<8xf32> to vector<8x1xf32>
    %cst_8 = arith.constant 3.200000e+01 : f32
    %19 = vector.broadcast %cst_8 : f32 to vector<8x1xf32>
    %20 = arith.divf %18, %19 : vector<8x1xf32>
    %21 = vector.broadcast %13 : vector<8x1xf32> to vector<8x32xf32>
    %22 = arith.subf %9, %21 : vector<8x32xf32>
    %cst_9 = arith.constant 9.99999974E-6 : f32
    %23 = vector.broadcast %cst_9 : f32 to vector<8x1xf32>
    %24 = arith.addf %20, %23 : vector<8x1xf32>
    %25 = math.rsqrt %24 : vector<8x1xf32>
    %26 = vector.broadcast %25 : vector<8x1xf32> to vector<8x32xf32>
    %27 = arith.mulf %22, %26 : vector<8x32xf32>
    %28 = vector.broadcast %0 : vector<1x32xf32> to vector<8x32xf32>
    %29 = arith.mulf %27, %28 : vector<8x32xf32>
    %30 = vector.broadcast %1 : vector<1x32xf32> to vector<8x32xf32>
    %31 = arith.addf %29, %30 : vector<8x32xf32>
    %32 = arith.truncf %31 : vector<8x32xf32> to vector<8x32xbf16>
    %c0_10 = arith.constant 0 : index
    %c0_11 = arith.constant 0 : index
    %33 = vector.load %arg5[%c0_10, %c0_11] : memref<32x32xbf16, #tpu.memory_space<vmem>>, vector<32x32xbf16>
    %cst_12 = arith.constant dense<0.000000e+00> : vector<8x32xf32>
    %34 = tpu.matmul %32, %33, %cst_12 {dimension_numbers = #tpu.dot_dimension_numbers<[1], [0], [0], [1], [0, 0, 1, 1], [], []>} : vector<8x32xbf16>, vector<32x32xbf16>, vector<8x32xf32> -> vector<8x32xf32>
    %cst_13 = arith.constant 0.353553385 : f32
    %35 = vector.broadcast %cst_13 : f32 to vector<8x32xf32>
    %36 = arith.mulf %34, %35 : vector<8x32xf32>
    %37 = arith.truncf %36 : vector<8x32xf32> to vector<8x32xbf16>
    %38 = vector.extract_strided_slice %37 {offsets = [0, 0], sizes = [8, 8], strides = [1, 1]} : vector<8x32xbf16> to vector<8x8xbf16>
    %c0_14 = arith.constant 0 : index
    %c0_15 = arith.constant 0 : index
    %c0_16 = arith.constant 0 : index
    %39 = vector.load %arg19[%c0_14, %c0_15, %c0_16] : memref<4x8x8xbf16, #tpu.memory_space<vmem>>, vector<1x8x8xbf16>
    %40 = vector.shape_cast %39 : vector<1x8x8xbf16> to vector<8x8xbf16>
    %41 = vector.shape_cast %38 : vector<8x8xbf16> to vector<1x8x8xbf16>
    tpu.vector_store %arg19[%c0_14, %c0_15, %c0_16], %41 {strides = array<i32>} : memref<4x8x8xbf16, #tpu.memory_space<vmem>>, vector<1x8x8xbf16>,
    %42 = vector.extract_strided_slice %37 {offsets = [0, 8], sizes = [8, 8], strides = [1, 1]} : vector<8x32xbf16> to vector<8x8xbf16>
    %c1 = arith.constant 1 : index
    %c0_17 = arith.constant 0 : index
    %c0_18 = arith.constant 0 : index
    %43 = vector.load %arg19[%c1, %c0_17, %c0_18] : memref<4x8x8xbf16, #tpu.memory_space<vmem>>, vector<1x8x8xbf16>
    %44 = vector.shape_cast %43 : vector<1x8x8xbf16> to vector<8x8xbf16>
    %45 = vector.shape_cast %42 : vector<8x8xbf16> to vector<1x8x8xbf16>
    tpu.vector_store %arg19[%c1, %c0_17, %c0_18], %45 {strides = array<i32>} : memref<4x8x8xbf16, #tpu.memory_space<vmem>>, vector<1x8x8xbf16>,
    %46 = vector.extract_strided_slice %37 {offsets = [0, 16], sizes = [8, 8], strides = [1, 1]} : vector<8x32xbf16> to vector<8x8xbf16>
    %c2 = arith.constant 2 : index
    %c0_19 = arith.constant 0 : index
    %c0_20 = arith.constant 0 : index
    %47 = vector.load %arg19[%c2, %c0_19, %c0_20] : memref<4x8x8xbf16, #tpu.memory_space<vmem>>, vector<1x8x8xbf16>
    %48 = vector.shape_cast %47 : vector<1x8x8xbf16> to vector<8x8xbf16>
    %49 = vector.shape_cast %46 : vector<8x8xbf16> to vector<1x8x8xbf16>
    tpu.vector_store %arg19[%c2, %c0_19, %c0_20], %49 {strides = array<i32>} : memref<4x8x8xbf16, #tpu.memory_space<vmem>>, vector<1x8x8xbf16>,
    %50 = vector.extract_strided_slice %37 {offsets = [0, 24], sizes = [8, 8], strides = [1, 1]} : vector<8x32xbf16> to vector<8x8xbf16>
    %c3 = arith.constant 3 : index
    %c0_21 = arith.constant 0 : index
    %c0_22 = arith.constant 0 : index
    %51 = vector.load %arg19[%c3, %c0_21, %c0_22] : memref<4x8x8xbf16, #tpu.memory_space<vmem>>, vector<1x8x8xbf16>
    %52 = vector.shape_cast %51 : vector<1x8x8xbf16> to vector<8x8xbf16>
    %53 = vector.shape_cast %50 : vector<8x8xbf16> to vector<1x8x8xbf16>
    tpu.vector_store %arg19[%c3, %c0_21, %c0_22], %53 {strides = array<i32>} : memref<4x8x8xbf16, #tpu.memory_space<vmem>>, vector<1x8x8xbf16>,
    %c0_23 = arith.constant 0 : index
    %c0_24 = arith.constant 0 : index
    %c0_25 = arith.constant 0 : index
    %54 = vector.load %arg19[%c0_23, %c0_24, %c0_25] : memref<4x8x8xbf16, #tpu.memory_space<vmem>>, vector<4x8x8xbf16>
    %c0_26 = arith.constant 0 : index
    %c0_27 = arith.constant 0 : index
    %c0_28 = arith.constant 0 : index
    %55 = vector.load %arg17[%c0_26, %c0_27, %c0_28] : memref<4x8x8xbf16, #tpu.memory_space<vmem>>, vector<4x8x8xbf16>
    "tpu.trace_start"() <{level = 10 : i32, message = "hqd,hkd->hqk"}> : () -> ()
    %cst_29 = arith.constant dense<0.000000e+00> : vector<4x8x8xf32>
    %56 = tpu.matmul %54, %55, %cst_29 {dimension_numbers = #tpu.dot_dimension_numbers<[2], [2], [1], [1], [0, 0, 0, 1, 1, 1], [0], [0]>} : vector<4x8x8xbf16>, vector<4x8x8xbf16>, vector<4x8x8xf32> -> vector<4x8x8xf32>
    "tpu.trace_stop"() : () -> ()
    %cst_30 = arith.constant dense<0xFF800000> : vector<4x8xf32>
    %57 = vector.multi_reduction <maximumf>, %56, %cst_30 [2] : vector<4x8x8xf32> to vector<4x8xf32>
    %58 = vector.shape_cast %57 : vector<4x8xf32> to vector<4x8x1xf32>
    %59 = vector.broadcast %58 : vector<4x8x1xf32> to vector<4x8x8xf32>
    %60 = arith.subf %56, %59 : vector<4x8x8xf32>
    %61 = math.exp %60 : vector<4x8x8xf32>
    %cst_31 = arith.constant dense<0.000000e+00> : vector<4x8xf32>
    %62 = vector.multi_reduction <add>, %61, %cst_31 [2] : vector<4x8x8xf32> to vector<4x8xf32>
    %63 = vector.shape_cast %62 : vector<4x8xf32> to vector<4x8x1xf32>
    %64 = tpu.reciprocal %63 {approx = true} : vector<4x8x1xf32> -> vector<4x8x1xf32>
    %65 = vector.broadcast %64 : vector<4x8x1xf32> to vector<4x8x8xf32>
    %66 = arith.mulf %61, %65 : vector<4x8x8xf32>
    %67 = arith.truncf %66 : vector<4x8x8xf32> to vector<4x8x8xbf16>
    %c0_32 = arith.constant 0 : index
    %c0_33 = arith.constant 0 : index
    %c0_34 = arith.constant 0 : index
    %68 = vector.load %arg18[%c0_32, %c0_33, %c0_34] : memref<4x8x8xbf16, #tpu.memory_space<vmem>>, vector<4x8x8xbf16>
    "tpu.trace_start"() <{level = 10 : i32, message = "hqk,hkd->hqd"}> : () -> ()
    %cst_35 = arith.constant dense<0.000000e+00> : vector<4x8x8xf32>
    %69 = tpu.matmul %67, %68, %cst_35 {dimension_numbers = #tpu.dot_dimension_numbers<[2], [1], [1], [2], [0, 0, 0, 1, 1, 2], [0], [0]>} : vector<4x8x8xbf16>, vector<4x8x8xbf16>, vector<4x8x8xf32> -> vector<4x8x8xf32>
    "tpu.trace_stop"() : () -> ()
    %70 = arith.truncf %69 : vector<4x8x8xf32> to vector<4x8x8xbf16>
    %c0_36 = arith.constant 0 : index
    %c0_37 = arith.constant 0 : index
    %c0_38 = arith.constant 0 : index
    %71 = vector.load %arg8[%c0_36, %c0_37, %c0_38] : memref<4x8x32xbf16, #tpu.memory_space<vmem>>, vector<4x8x32xbf16>
    "tpu.trace_start"() <{level = 10 : i32, message = "hqd,hdc->hqc"}> : () -> ()
    %cst_39 = arith.constant dense<0.000000e+00> : vector<4x8x32xf32>
    %72 = tpu.matmul %70, %71, %cst_39 {dimension_numbers = #tpu.dot_dimension_numbers<[2], [1], [1], [2], [0, 0, 0, 1, 1, 2], [0], [0]>} : vector<4x8x8xbf16>, vector<4x8x32xbf16>, vector<4x8x32xf32> -> vector<4x8x32xf32>
    "tpu.trace_stop"() : () -> ()
    %cst_40 = arith.constant dense<0.000000e+00> : vector<8x32xf32>
    %73 = vector.multi_reduction <add>, %72, %cst_40 [0] : vector<4x8x32xf32> to vector<8x32xf32>
    %c0_41 = arith.constant 0 : index
    %c0_42 = arith.constant 0 : index
    %74 = vector.load %arg9[%c0_41, %c0_42] : memref<1x32xf32, #tpu.memory_space<vmem>>, vector<1x32xf32>
    %75 = vector.broadcast %74 : vector<1x32xf32> to vector<8x32xf32>
    %76 = arith.addf %73, %75 : vector<8x32xf32>
    %77 = arith.addf %9, %76 : vector<8x32xf32>
    %c0_43 = arith.constant 0 : index
    %c0_44 = arith.constant 0 : index
    %78 = vector.load %arg10[%c0_43, %c0_44] : memref<1x32xf32, #tpu.memory_space<vmem>>, vector<1x32xf32>
    %c0_45 = arith.constant 0 : index
    %c0_46 = arith.constant 0 : index
    %79 = vector.load %arg11[%c0_45, %c0_46] : memref<1x32xf32, #tpu.memory_space<vmem>>, vector<1x32xf32>
    %cst_47 = arith.constant dense<0.000000e+00> : vector<8xf32>
    %80 = vector.multi_reduction <add>, %77, %cst_47 [1] : vector<8x32xf32> to vector<8xf32>
    %81 = vector.shape_cast %80 : vector<8xf32> to vector<8x1xf32>
    %cst_48 = arith.constant 3.200000e+01 : f32
    %82 = vector.broadcast %cst_48 : f32 to vector<8x1xf32>
    %83 = arith.divf %81, %82 : vector<8x1xf32>
    %84 = vector.broadcast %83 : vector<8x1xf32> to vector<8x32xf32>
    %85 = arith.subf %77, %84 : vector<8x32xf32>
    %86 = arith.mulf %85, %85 : vector<8x32xf32>
    %cst_49 = arith.constant dense<0.000000e+00> : vector<8xf32>
    %87 = vector.multi_reduction <add>, %86, %cst_49 [1] : vector<8x32xf32> to vector<8xf32>
    %88 = vector.shape_cast %87 : vector<8xf32> to vector<8x1xf32>
    %cst_50 = arith.constant 3.200000e+01 : f32
    %89 = vector.broadcast %cst_50 : f32 to vector<8x1xf32>
    %90 = arith.divf %88, %89 : vector<8x1xf32>
    %91 = vector.broadcast %83 : vector<8x1xf32> to vector<8x32xf32>
    %92 = arith.subf %77, %91 : vector<8x32xf32>
    %cst_51 = arith.constant 9.99999974E-6 : f32
    %93 = vector.broadcast %cst_51 : f32 to vector<8x1xf32>
    %94 = arith.addf %90, %93 : vector<8x1xf32>
    %95 = math.rsqrt %94 : vector<8x1xf32>
    %96 = vector.broadcast %95 : vector<8x1xf32> to vector<8x32xf32>
    %97 = arith.mulf %92, %96 : vector<8x32xf32>
    %98 = vector.broadcast %78 : vector<1x32xf32> to vector<8x32xf32>
    %99 = arith.mulf %97, %98 : vector<8x32xf32>
    %100 = vector.broadcast %79 : vector<1x32xf32> to vector<8x32xf32>
    %101 = arith.addf %99, %100 : vector<8x32xf32>
    %102 = arith.truncf %101 : vector<8x32xf32> to vector<8x32xbf16>
    %c0_52 = arith.constant 0 : index
    %c0_53 = arith.constant 0 : index
    %103 = vector.load %arg12[%c0_52, %c0_53] : memref<32x128xbf16, #tpu.memory_space<vmem>>, vector<32x128xbf16>
    %cst_54 = arith.constant dense<0.000000e+00> : vector<8x128xf32>
    %104 = tpu.matmul %102, %103, %cst_54 {dimension_numbers = #tpu.dot_dimension_numbers<[1], [0], [0], [1], [0, 0, 1, 1], [], []>} : vector<8x32xbf16>, vector<32x128xbf16>, vector<8x128xf32> -> vector<8x128xf32>
    %c0_55 = arith.constant 0 : index
    %c0_56 = arith.constant 0 : index
    %105 = vector.load %arg13[%c0_55, %c0_56] : memref<1x128xf32, #tpu.memory_space<vmem>>, vector<1x128xf32>
    %106 = vector.broadcast %105 : vector<1x128xf32> to vector<8x128xf32>
    %107 = arith.addf %104, %106 : vector<8x128xf32>
    %cst_57 = arith.constant 2.000000e+01 : f32
    %108 = vector.broadcast %cst_57 : f32 to vector<8x128xf32>
    %109 = arith.minimumf %107, %108 : vector<8x128xf32>
    %110 = math.exp %109 : vector<8x128xf32>
    %cst_58 = arith.constant 1.000000e+00 : f32
    %111 = vector.broadcast %cst_58 : f32 to vector<8x128xf32>
    %112 = arith.addf %111, %110 : vector<8x128xf32>
    %113 = arith.mulf %112, %112 : vector<8x128xf32>
    %cst_59 = arith.constant 1.000000e+00 : f32
    %114 = vector.broadcast %cst_59 : f32 to vector<8x128xf32>
    %115 = arith.subf %113, %114 : vector<8x128xf32>
    %cst_60 = arith.constant 1.000000e+00 : f32
    %116 = vector.broadcast %cst_60 : f32 to vector<8x128xf32>
    %117 = arith.addf %113, %116 : vector<8x128xf32>
    %118 = tpu.reciprocal %117 {approx = true} : vector<8x128xf32> -> vector<8x128xf32>
    %119 = arith.mulf %115, %118 : vector<8x128xf32>
    %120 = arith.mulf %107, %119 : vector<8x128xf32>
    %121 = arith.truncf %120 : vector<8x128xf32> to vector<8x128xbf16>
    %c0_61 = arith.constant 0 : index
    %c0_62 = arith.constant 0 : index
    %122 = vector.load %arg14[%c0_61, %c0_62] : memref<128x32xbf16, #tpu.memory_space<vmem>>, vector<128x32xbf16>
    %cst_63 = arith.constant dense<0.000000e+00> : vector<8x32xf32>
    %123 = tpu.matmul %121, %122, %cst_63 {dimension_numbers = #tpu.dot_dimension_numbers<[1], [0], [0], [1], [0, 0, 1, 1], [], []>} : vector<8x128xbf16>, vector<128x32xbf16>, vector<8x32xf32> -> vector<8x32xf32>
    %c0_64 = arith.constant 0 : index
    %c0_65 = arith.constant 0 : index
    %124 = vector.load %arg15[%c0_64, %c0_65] : memref<1x32xf32, #tpu.memory_space<vmem>>, vector<1x32xf32>
    %125 = vector.broadcast %124 : vector<1x32xf32> to vector<8x32xf32>
    %126 = arith.addf %123, %125 : vector<8x32xf32>
    %127 = arith.addf %77, %126 : vector<8x32xf32>
    %c0_66 = arith.constant 0 : index
    %c0_67 = arith.constant 0 : index
    %c0_68 = arith.constant 0 : index
    %128 = vector.load %arg16[%c0_66, %c0_67, %c0_68] : memref<1x8x32xf32, #tpu.memory_space<vmem>>, vector<1x8x32xf32>
    %129 = vector.shape_cast %128 : vector<1x8x32xf32> to vector<8x32xf32>
    %130 = vector.shape_cast %127 : vector<8x32xf32> to vector<1x8x32xf32>
    tpu.vector_store %arg16[%c0_66, %c0_67, %c0_68], %130 {strides = array<i32>} : memref<1x8x32xf32, #tpu.memory_space<vmem>>, vector<1x8x32xf32>,
    return
  }
  func.func @transform_0(%arg0: i32, %arg1: i32) -> (i32, i32, i32) {
    %c0_i32 = arith.constant 0 : i32
    %c0_i32_0 = arith.constant 0 : i32
    %c0_i32_1 = arith.constant 0 : i32
    return %arg0, %c0_i32, %c0_i32_0 : i32, i32, i32
  }
  func.func @transform_1(%arg0: i32, %arg1: i32) -> (i32, i32) {
    %c0_i32 = arith.constant 0 : i32
    %c0_i32_0 = arith.constant 0 : i32
    %c0_i32_1 = arith.constant 0 : i32
    return %c0_i32, %c0_i32_0 : i32, i32
  }
  func.func @transform_2(%arg0: i32, %arg1: i32) -> (i32, i32) {
    %c0_i32 = arith.constant 0 : i32
    %c0_i32_0 = arith.constant 0 : i32
    %c0_i32_1 = arith.constant 0 : i32
    return %c0_i32, %c0_i32_0 : i32, i32
  }
  func.func @transform_3(%arg0: i32, %arg1: i32) -> (i32, i32) {
    %c0_i32 = arith.constant 0 : i32
    %c0_i32_0 = arith.constant 0 : i32
    %c0_i32_1 = arith.constant 0 : i32
    return %c0_i32, %c0_i32_0 : i32, i32
  }
  func.func @transform_4(%arg0: i32, %arg1: i32) -> (i32, i32) {
    %c0_i32 = arith.constant 0 : i32
    %c0_i32_0 = arith.constant 0 : i32
    %c0_i32_1 = arith.constant 0 : i32
    return %c0_i32, %c0_i32_0 : i32, i32
  }
  func.func @transform_5(%arg0: i32, %arg1: i32) -> (i32, i32) {
    %c0_i32 = arith.constant 0 : i32
    %c0_i32_0 = arith.constant 0 : i32
    %c0_i32_1 = arith.constant 0 : i32
    return %c0_i32, %c0_i32_0 : i32, i32
  }
  func.func @transform_6(%arg0: i32, %arg1: i32) -> (i32, i32, i32) {
    %c0_i32 = arith.constant 0 : i32
    %c0_i32_0 = arith.constant 0 : i32
    %c0_i32_1 = arith.constant 0 : i32
    %c0_i32_2 = arith.constant 0 : i32
    return %c0_i32, %c0_i32_0, %c0_i32_1 : i32, i32, i32
  }
  func.func @transform_7(%arg0: i32, %arg1: i32) -> (i32, i32) {
    %c0_i32 = arith.constant 0 : i32
    %c0_i32_0 = arith.constant 0 : i32
    %c0_i32_1 = arith.constant 0 : i32
    return %c0_i32, %c0_i32_0 : i32, i32
  }
  func.func @transform_8(%arg0: i32, %arg1: i32) -> (i32, i32) {
    %c0_i32 = arith.constant 0 : i32
    %c0_i32_0 = arith.constant 0 : i32
    %c0_i32_1 = arith.constant 0 : i32
    return %c0_i32, %c0_i32_0 : i32, i32
  }
  func.func @transform_9(%arg0: i32, %arg1: i32) -> (i32, i32) {
    %c0_i32 = arith.constant 0 : i32
    %c0_i32_0 = arith.constant 0 : i32
    %c0_i32_1 = arith.constant 0 : i32
    return %c0_i32, %c0_i32_0 : i32, i32
  }
  func.func @transform_10(%arg0: i32, %arg1: i32) -> (i32, i32) {
    %c0_i32 = arith.constant 0 : i32
    %c0_i32_0 = arith.constant 0 : i32
    %c0_i32_1 = arith.constant 0 : i32
    return %c0_i32, %c0_i32_0 : i32, i32
  }
  func.func @transform_11(%arg0: i32, %arg1: i32) -> (i32, i32) {
    %c0_i32 = arith.constant 0 : i32
    %c0_i32_0 = arith.constant 0 : i32
    %c0_i32_1 = arith.constant 0 : i32
    return %c0_i32, %c0_i32_0 : i32, i32
  }
  func.func @transform_12(%arg0: i32, %arg1: i32) -> (i32, i32) {
    %c0_i32 = arith.constant 0 : i32
    %c0_i32_0 = arith.constant 0 : i32
    %c0_i32_1 = arith.constant 0 : i32
    return %c0_i32, %c0_i32_0 : i32, i32
  }
  func.func @transform_13(%arg0: i32, %arg1: i32) -> (i32, i32) {
    %c0_i32 = arith.constant 0 : i32
    %c0_i32_0 = arith.constant 0 : i32
    %c0_i32_1 = arith.constant 0 : i32
    return %c0_i32, %c0_i32_0 : i32, i32
  }
  func.func @transform_14(%arg0: i32, %arg1: i32) -> (i32, i32, i32) {
    %c0_i32 = arith.constant 0 : i32
    %c0_i32_0 = arith.constant 0 : i32
    return %arg0, %arg1, %c0_i32 : i32, i32, i32
  }
}

</mosaic_0001>

<bundles_post_ra>
// kernel: tpu_custom_call.1
= control target key start
LH: loop header
LB: loop body
LE: loop exit
PB: predicated region body
PF: predicated region fallthrough
CT: control target
= control target key end

     0   :  { %s2857_s0 = inlined_call_operand.vmem [shape: f32[2,8,32], index: 0, kind: input, shape index: {}]   ;;  %s2858_s1 = inlined_call_operand.vmem [shape: f32[1,32], index: 1, kind: input, shape index: {}]   ;;  %s2859_s2 = inlined_call_operand.vmem [shape: f32[1,32], index: 2, kind: input, shape index: {}]   ;;  %s2860_s3 = inlined_call_operand.vmem [shape: bf16[32,32], index: 3, kind: input, shape index: {}]   ;;  %s2861_s4 = inlined_call_operand.vmem [shape: bf16[32,32], index: 4, kind: input, shape index: {}]   ;;  %s2862_s5 = inlined_call_operand.vmem [shape: bf16[32,32], index: 5, kind: input, shape index: {}]   ;;  %s2863_s6 = inlined_call_operand.vmem [shape: bf16[4,8,32], index: 6, kind: input, shape index: {}]   ;;  %s2864_s7 = inlined_call_operand.hbm [shape: f32[1,32], index: 7, kind: input, shape index: {}]   ;;  %s2865_s8 = inlined_call_operand.hbm [shape: f32[1,32], index: 8, kind: input, shape index: {}]   ;;  %s2866_s9 = inlined_call_operand.hbm [shape: f32[1,32], index: 9, kind: input, shape index: {}]   ;;  %s2867_s10 = inlined_call_operand.vmem [shape: bf16[32,128], index: 10, kind: input, shape index: {}]   ;;  %s2868_s11 = inlined_call_operand.vmem [shape: f32[1,128], index: 11, kind: input, shape index: {}]   ;;  %s2869_s12 = inlined_call_operand.vmem [shape: bf16[128,32], index: 12, kind: input, shape index: {}]   ;;  %s2870_s13 = inlined_call_operand.vmem [shape: f32[1,32], index: 13, kind: input, shape index: {}]   ;;  %s2871_s14 = inlined_call_operand.hbm [shape: f32[2,8,32], index: 14, kind: output, shape index: {}]  }
   0x1   :  { %2886 = sst [smem:[#allocation23_spill]] %s2865_s8 }
   0x2   :  { %2887 = sst [smem:[#allocation24_spill]] %s2871_s14 }
   0x3   :  { %19 = vsyncpa [#allocation6], 0 }
   0x4   :  { %20 = vsyncpa [#allocation9], 0 }
   0x5   :  { %21 = vsyncpa [#allocation7], 0 }
   0x6   :  { %23 = vsyncpa [#allocation7 + $0x1], 0  ;;  %s2433_s29 = smov 0   ;;  %s2435_s30 = smov 0  }
   0x7   :  { %s2437_s15 = smov 0   ;;  %s2439_s16 = smov 0  }
   0x8   :  { %s2441_s17 = smov 0   ;;  %s2443_s18 = smov 0  }
   0x9 LB: > { %2888 = sst [smem:[#allocation15_spill]] %s2327_s29  ;;  %s1812_s19 = sadd.s32 4294967295, %s2347_s18   ;;  %s2347_s18 = sphi %s2443_s18, %s29_s18   ;;  %s2343_s17 = sphi %s2441_s17, %s2915_s17   ;;  %s2339_s16 = sphi %s2439_s16, %s2914_s16   ;;  %s2335_s15 = sphi %s2437_s15, %s2913_s15   ;;  %s2331_s30 = sphi %s2435_s30, %s2917_s30   ;;  %s2327_s29 = sphi %s2433_s29, %s2916_s29  }
   0xa   : > { %2889 = sst [smem:[#allocation16_spill]] %s2335_s15  ;;  %s1813_s20 = sadd.s32 4294967294, %s2347_s18  }
   0xb   : > { %2890 = sst [smem:[#allocation17_spill]] %s2343_s17  ;;  %s41_s21 = sadd.s32 1, %s2343_s17 }
   0xc   : > { %2891 = sst [smem:[#allocation18_spill]] %s2347_s18  ;;  %s349_s22 = sadd.s32 1, %s2335_s15 }
   0xd   : > { %p43_p0 = scmp.ge.s32.totalorder %s41_s21, 2  ;;  %p359_p1 = scmp.ne.s32.totalorder %s2335_s15, %s2331_s30 }
   0xe   : > { %p360_p2 = scmp.eq.s32.totalorder %s1812_s19, 1  ;;  %p365_p3 = scmp.ne.s32.totalorder %s2331_s30, %s2327_s29 }
   0xf   : > { %s2919_s21 = smov (%p43_p0, %s41_s21), 0  ;;  %p366_p5 = scmp.eq.s32.totalorder %s1813_s20, 1 }
  0x10   : > { %2892 = sst [smem:[#allocation19_spill]] %s2919_s21  ;;  %p2473_p4 = por %p360_p2, %p359_p1 }
  0x11   : > { %s344_s24 = ssub.s32 %s2343_s17, %s2919_s21  ;;  %p1814_p6 = scmp.ge.s32.totalorder %s2347_s18, 1 }
  0x12   : > { %s2893_s23 = scalar_select %p2473_p4, 1, 0 }
  0x13   : > { %p347_p7 = scmp.eq.s32.totalorder %s344_s24, 0  ;;  %p2480_p8 = por %p366_p5, %p365_p3 }
  0x14   : > { %2894 = sst [smem:[#allocation20_spill]] %s2893_s23  ;;  %p373_p9 = scmp.lt.s32.totalorder %s2347_s18, 3 }
  0x15   : > { %s2895_s25 = scalar_select %p2480_p8, 1, 0 }
  0x16   : > { %s2486_s26 = scalar_select %p347_p7, %s2335_s15, %s349_s22  }
  0x17   : > { %2896 = sst [smem:[#allocation21_spill]] %s2895_s25  ;;  %p2488_p10 = pnand %p1814_p6, %p373_p9 }
  0x18   : > { %2897 = sst [smem:[#allocation22_spill]] %s2486_s26  ;;  %p2492_p11 = scmp.eq.s32.totalorder %s1812_s19, 0 }
  0x19   : > { %s2898_s27 = scalar_select %p2488_p10, 1, 0 }
  0x1a   : > { %s2899_s28 = scalar_select %p2492_p11, 1, 0 }
  0x1b   : > { %p2058_p12 = pneg %p2488_p10  ;;  %s2349_s20 = smov [#allocation8]  }
  0x1c   : > { %s415_s24 = sshll.u32 %s2349_s20, 4  ;;  %s2350_s22 = smov [#allocation5]   ;;  %s416_s24 = int_to_ptr.vmem [resolvable:$true] %s415_s24 }
  0x1d   : > { %p2500_p13 = pnand %p2492_p11, %p2058_p12  ;;  %s404_s17 = sshll.u32 %s2350_s22, 4  ;;  %s2504_s17 = int_to_ptr.vmem [resolvable:$true] %s404_s17 }
  0x1e   : > { %s2901_s8 = sld [smem:[#allocation23_spill]] }
  0x1f   : > { %p2514_p1 = pneg %p2500_p13 }
  0x24   : > { %s2177_s15 = scalar_lea.hbm %s2901_s8, 16 }
  0x25   : > { %p2178_p0 = scmp.ne.s32.totalorder %s2901_s8, %s2177_s15  ;;  %p2184_p5 = scmp.lt.u32.totalorder %s2177_s15, %s2901_s8 }
  0x27   : > { %p2180_p2 = pnand %p2514_p1, %p2178_p0 }
  0x29   : > { %p2181_p3 = pneg %p2180_p2 }
  0x2b   : > { %p2186_p6 = pnand %p2184_p5, %p2181_p3 }
  0x2d   : > { %2189 = shalt.err (!%p2186_p6)
}
  0x2e   : > { %s2190_s26 = scalar_lea.vmem %s416_s24, 16  ;;  %s2197_s29 = scalar_lea.vmem %s416_s24, 32 }
  0x2f   : > { %p2191_p7 = scmp.ne.s32.totalorder %s416_s24, %s2190_s26  ;;  %p2198_p8 = scmp.lt.s32.totalorder %s416_s24, %s416_s24 }
  0x30   : > { %p2199_p4 = scmp.lt.s32.totalorder %s2197_s29, %s2190_s26 }
  0x31   : > { %p2193_p9 = pnand %p2191_p7, %p2514_p1 }
  0x32   : > { %p2200_p11 = por %p2199_p4, %p2198_p8 }
  0x33   : > { %p2194_p12 = pneg %p2193_p9 }
  0x35   : > { %p2201_p10 = pnand %p2200_p11, %p2194_p12 }
  0x37   : > { %2204 = shalt.err (!%p2201_p10)
}
  0x38   : > { %2064 = dma.hbm_to_vmem [thread:$0]  (!%p2500_p13), %s2901_s8, 16, %s416_s24, [#allocation9]  }
  0x39   : > { %s2205_s22 = scalar_lea.hbm %s2864_s7, 16 }
  0x3a   : > { %p2206_p0 = scmp.ne.s32.totalorder %s2864_s7, %s2205_s22  ;;  %p2212_p8 = scmp.lt.u32.totalorder %s2205_s22, %s2864_s7 }
  0x3c   : > { %p2208_p2 = pnand %p2206_p0, %p2514_p1 }
  0x3e   : > { %p2209_p4 = pneg %p2208_p2 }
  0x40   : > { %p2214_p10 = pnand %p2212_p8, %p2209_p4 }
  0x42   : > { %2217 = shalt.err (!%p2214_p10)
}
  0x43   : > { %s2218_s24 = scalar_lea.vmem %s2504_s17, 16  ;;  %s2225_s14 = scalar_lea.vmem %s2504_s17, 32 }
  0x44   : > { %p2219_p11 = scmp.ne.s32.totalorder %s2504_s17, %s2218_s24  ;;  %p2226_p6 = scmp.lt.s32.totalorder %s2504_s17, %s2504_s17 }
  0x45   : > { %p2227_p7 = scmp.lt.s32.totalorder %s2225_s14, %s2218_s24 }
  0x46   : > { %p2221_p3 = pnand %p2219_p11, %p2514_p1 }
  0x47   : > { %p2228_p9 = por %p2227_p7, %p2226_p6 }
  0x48   : > { %p2222_p5 = pneg %p2221_p3 }
  0x4a   : > { %p2229_p12 = pnand %p2228_p9, %p2222_p5 }
  0x4c   : > { %2232 = shalt.err (!%p2229_p12)
}
  0x4d   : > { %2061 = dma.hbm_to_vmem [thread:$0]  (!%p2500_p13), %s2864_s7, 16, %s2504_s17, [#allocation6]  }
  0x4e   : > { %s2351_s19 = smov [#allocation10]   ;;  %s2233_s26 = scalar_lea.hbm %s2866_s9, 16 }
  0x4f   : > { %s426_s15 = sshll.u32 %s2351_s19, 4  ;;  %p2234_p0 = scmp.ne.s32.totalorder %s2866_s9, %s2233_s26  ;;  %s427_s15 = int_to_ptr.vmem [resolvable:$true] %s426_s15 }
  0x50   : > { %p2240_p8 = scmp.lt.u32.totalorder %s2233_s26, %s2866_s9 }
  0x51   : > { %p2236_p2 = pnand %p2234_p0, %p2514_p1 }
  0x53   : > { %p2237_p4 = pneg %p2236_p2 }
  0x55   : > { %p2242_p10 = pnand %p2240_p8, %p2237_p4 }
  0x57   : > { %2245 = shalt.err (!%p2242_p10)
}
  0x58   : > { %s2246_s17 = scalar_lea.vmem %s427_s15, 16  ;;  %s2253_s23 = scalar_lea.vmem %s427_s15, 32 }
  0x59   : > { %p2247_p11 = scmp.ne.s32.totalorder %s427_s15, %s2246_s17  ;;  %p2254_p6 = scmp.lt.s32.totalorder %s427_s15, %s427_s15 }
  0x5a   : > { %p2255_p7 = scmp.lt.s32.totalorder %s2253_s23, %s2246_s17 }
  0x5b   : > { %p2249_p3 = pnand %p2247_p11, %p2514_p1 }
  0x5c   : > { %p2256_p9 = por %p2255_p7, %p2254_p6 }
  0x5d   : > { %p2250_p5 = pneg %p2249_p3 }
  0x5f   : > { %p2257_p12 = pnand %p2256_p9, %p2250_p5 }
  0x61   : > { %2260 = shalt.err (!%p2257_p12)
}
  0x62   : > { %2067 = dma.hbm_to_vmem [thread:$0]  (!%p2500_p13), %s2866_s9, 16, %s427_s15, [#allocation9]  }
  0x63   : > { %p2903_p0 = scmp.ne.s32.totalorder %s2898_s27, 0 }
  0x64   : > { %p2904_p2 = scmp.ne.s32.totalorder (!%p2903_p0), %s2899_s28, 0 }
  0x65   : > { %458 = sbr.rel (%p2903_p0) target bundleno = 2600 (0xa28), region = 76 }
  0x6c   : > { %2314 = dma.done.wait (%p2904_p2), [#allocation6], 16  }
  0x6d   : > { %2316 = vsyncadd (%p2904_p2), [#allocation6], 4294967280 }
  0x6e   : > { %2318 = dma.done.wait (%p2904_p2), [#allocation9], 32  }
  0x6f   : > { %2320 = vsyncadd (%p2904_p2), [#allocation9], 4294967264  ;;  %p511_p1 = scmp.lt.s32.totalorder %s2339_s16, 1  ;;  %vm523_vm0 = vcmask 261120   ;;  %v2135_v12 = vld [vmem:[%s2861_s4] sm:$0xff]   ;;  %v2352_v13 = vmov 0.0  }
  0x70   : > { %1920 = vmatprep.subr.bf16.mxu1 %v2352_v13  ;;  %1950 = vmatprep.subr.bf16.mxu0 %v2352_v13  ;;  %v2136_v14 = vld [vmem:[%s2861_s4 + $0x8] sm:$0xff]   ;;  %vm2353_vm1 = vmmov 0   ;;  %v1873_v22 = vld [vmem:[%s2858_s1] ss:$0 sm:$0xff]  ;;  %vm670_vm2 = vcmask 60416   ;;  %s2354_s28 = smov 112  }
  0x71   : > { %s512_s8 = scalar_select %p511_p1, %s2339_s16, 1  ;;  %1921 = vmatpush3.bf16.msra.mxu1 %v2135_v12  ;;  %1924 = vmatprep.mubr.msk.bf16.mxu1 %vm2353_vm1, %v2352_v13  ;;  %v1874_v24 = vld [vmem:[%s2859_s2] ss:$0 sm:$0xff]  ;;  %v2138_v30 = vld [vmem:[%s2862_s5 + $0x8] sm:$0xff]   ;;  %vm840_vm3 = vcmask 64512   ;;  %vm1080_vm4 = vcmask 1043456  }
  0x72   : > { %1922 = vmatprep.subr.bf16.mxu1 %v2352_v13  ;;  %1952 = vmatprep.mubr.msk.bf16.mxu0 %vm2353_vm1, %v2352_v13  ;;  %v2137_v27 = vld [vmem:[%s2862_s5] sm:$0xff]   ;;  %v2140_v34 = vld [vmem:[%s2860_s3 + $0x8] sm:$0xff]   ;;  %s2355_s18 = smov 120   ;;  %s2356_s22 = smov 104  }
  0x73   : > { %s1824_s21 = sshll.u32 %s512_s8, 3  ;;  %v2139_v32 = vld [vmem:[%s2860_s3] sm:$0xff]   ;;  %s2905_s24 = sld [smem:[#allocation20_spill]] }
  0x74   : > { %s514_s15 = scalar_lea.vmem %s2857_s0, %s1824_s21  ;;  %s1867_s14 = sshll.u32 %s2339_s16, 7 }
  0x75   : > { %v2587_v0 = vld [vmem:[%s514_s15] sm:$0xff]  ;;  %1923 = vmatpush3.bf16.msra.mxu1 %v2136_v14  ;;  %s2906_s8 = sld [smem:[#allocation24_spill]]  ;;  %s2357_s27 = smov [#allocation11]  }
  0x76   : > { %v524_v1 = vsel %vm523_vm0, %v2587_v0, 0.0  ;;  %1928 = vmatprep.subr.bf16.mxu1 %v2352_v13  ;;  %s2265_s15 = sshll.u32 %s2357_s27, 4  ;;  %s2266_s15 = int_to_ptr.vmem [resolvable:$false] %s2265_s15 }
  0x77   : > { %525 = vadd.xlane.f32.xlu0 %v524_v1 }
  0x79   : > { %p2907_p4 = scmp.ne.s32.totalorder %s2905_s24, 0 }
  0x7b   : > { %723 = vadd.xlane.f32.xlu0 %v524_v1  ;;  %s2809_s21 = scalar_lea.hbm %s2906_s8, %s1867_s14 }
 0x104   : > { %v526_v2 = vpop.xlane.xlu0 %525 }
 0x105   : > { %v528_v3 = vmul.f32 0.03125, %v526_v2 }
 0x107   : > { %v529_v4 = vsub.f32 %v2587_v0, %v528_v3 }
 0x108   : > { %v724_v5 = vpop.xlane.xlu0 %723 }
 0x109   : > { %v726_v6 = vmul.f32 0.03125, %v724_v5  ;;  %v530_v7 = vmul.f32 %v529_v4, %v529_v4 }
 0x10b   : > { %v727_v8 = vsub.f32 %v2587_v0, %v726_v6  ;;  %v531_v9 = vsel %vm523_vm0, %v530_v7, 0.0 }
 0x10c   : > { %532 = vadd.xlane.f32.xlu1 %v531_v9 }
 0x10d   : > { %v728_v10 = vmul.f32 %v727_v8, %v727_v8 }
 0x10f   : > { %v729_v11 = vsel %vm523_vm0, %v728_v10, 0.0 }
 0x110   : > { %730 = vadd.xlane.f32.xlu1 %v729_v11 }
 0x199   : > { %v533_v15 = vpop.xlane.xlu1 %532 }
 0x19a   : > { %v534_v16 = vmul.f32 0.03125, %v533_v15 }
 0x19c   : > { %v535_v17 = vadd.f32 1e-05, %v534_v16 }
 0x19d   : > { %v731_v18 = vpop.xlane.xlu1 %730 }
 0x19e   : > { %2151 = vrsqrt.f32 %v535_v17  ;;  %v732_v19 = vmul.f32 0.03125, %v731_v18 }
 0x1a0   : > { %v733_v20 = vadd.f32 1e-05, %v732_v19 }
 0x1a2   : > { %2153 = vrsqrt.f32 %v733_v20 }
 0x1a8   : > { %v2152_v21 = vpop.eup %2151 }
 0x1a9   : > { %v537_v23 = vmul.f32 %v2152_v21, %v529_v4 }
 0x1ab   : > { %v544_v25 = vmul.f32 %v1873_v22, %v537_v23 }
 0x1ac   : > { %v2154_v29 = vpop.eup %2153 }
 0x1ad   : > { %v551_v26 = vadd.f32 %v1874_v24, %v544_v25  ;;  %v735_v31 = vmul.f32 %v2154_v29, %v727_v8 }
 0x1af   : > { %v552_v28 = vpack.c.bf16 %v551_v26, %v551_v26  ;;  %v742_v33 = vmul.f32 %v1873_v22, %v735_v31 }
 0x1b1   : > { %1925 = vmatmul.mubr.msk.bf16.vlgmr.msra.gmra.mrb[0].mxu1 %vm523_vm0, %v552_v28  ;;  %v749_v35 = vadd.f32 %v1874_v24, %v742_v33 }
 0x1b2   : > { %1929 = vmatpush3.bf16.msra.mxu1 %v2137_v27  ;;  %1932 = vmatprep.mubr.msk.bf16.mxu1 %vm2353_vm1, %v2352_v13 }
 0x1b3   : > { %1930 = vmatprep.subr.bf16.mxu1 %v2352_v13  ;;  %v750_v36 = vpack.c.bf16 %v749_v35, %v749_v35 }
 0x1b6   : > { %1931 = vmatpush3.bf16.msra.mxu1 %v2138_v30 }
 0x1b7   : > { %1936 = vmatprep.subr.bf16.mxu1 %v2352_v13 }
 0x1b9   : > { %1933 = vmatmul.mubr.msk.bf16.vlgmr.msra.gmra.mrb[4].mxu1 %vm523_vm0, %v552_v28 }
 0x1ba   : > { %1937 = vmatpush3.bf16.msra.mxu1 %v2139_v32  ;;  %1940 = vmatprep.mubr.msk.bf16.mxu1 %vm2353_vm1, %v2352_v13 }
 0x1bb   : > { %1938 = vmatprep.subr.bf16.mxu1 %v2352_v13 }
 0x1be   : > { %1939 = vmatpush3.bf16.msra.mxu1 %v2140_v34 }
 0x1bf   : > { %1944 = vmatprep.subr.bf16.mxu1 %v2352_v13 }
 0x1c1   : > { %1941 = vmatmul.mubr.msk.bf16.vlgmr.msra.gmra.mrb[8].mxu1 %vm523_vm0, %v750_v36 }
 0x1c2   : > { %1946 = vmatprep.mubr.msk.bf16.mxu1 %vm2353_vm1, %v2352_v13 }
 0x284   : > { %v606_v37 = vpop.f32.mrb[0].mxu1 }
 0x285   : > { %v612_v38 = vpack.c.bf16 %v606_v37, %v606_v37  ;;  %v1926_v39 = vpop.f32.mrb[1].mxu1 }
 0x286   : > { %v609_v40 = vpop.f32.mrb[2].mxu1 }
 0x287   : > { %671 = vst.msk [vmem:[#allocation2] sm:$0xf] %vm670_vm2, %v612_v38  ;;  %692 = vrot.lane.b32.xlu1 %v612_v38, %s2354_s28  ;;  %676 = vrot.lane.b32.xlu0 %v612_v38, %s2355_s18  ;;  %v1927_v41 = vpop.f32.mrb[3].mxu1 }
 0x28b   : > { %705 = vrot.lane.b32.xlu1 %v612_v38, %s2356_s22 }
 0x28c   : > { %v663_v42 = vpop.f32.mrb[4].mxu1 }
 0x28d   : > { %v2644_v43 = vpack.c.bf16 %v663_v42, %v663_v42  ;;  %v1934_v44 = vpop.f32.mrb[5].mxu1 }
 0x28e   : > { %v666_v45 = vpop.f32.mrb[6].mxu1  ;;  %v836_v46 = vld [vmem:[#allocation2] sm:$0xf] }
 0x28f   : > { %672 = vst.msk [vmem:[#allocation3] sm:$0xf] %vm670_vm2, %v2644_v43  ;;  %v1935_v47 = vpop.f32.mrb[7].mxu1  ;;  %v845_v48 = vsel %vm840_vm3, %v836_v46, 0 }
 0x290   : > { %1945 = vmatpush3.bf16.xpose.msra.mxu1 %v845_v48 }
 0x291   : > { %1956 = vmatprep.subr.bf16.mxu1 %v2352_v13 }
 0x294   : > { %v804_v49 = vpop.f32.mrb[8].mxu1 }
 0x295   : > { %v810_v50 = vmul.f32 0.35355338, %v804_v49  ;;  %v1942_v51 = vpop.f32.mrb[9].mxu1 }
 0x296   : > { %v807_v52 = vpop.f32.mrb[10].mxu1  ;;  %v1073_v4 = vld [vmem:[#allocation3] sm:$0xf] }
 0x297   : > { %v811_v53 = vpack.c.bf16 %v810_v50, %v810_v50  ;;  %v1943_v54 = vpop.f32.mrb[11].mxu1  ;;  %v1082_v8 = vsel %vm1080_vm4, %v1073_v4, 0 }
 0x299   : > { %813 = vst.msk [vmem:[#allocation4] sm:$0xf] %vm670_vm2, %v811_v53  ;;  %822 = vrot.lane.b32.xlu0 %v811_v53, %s2354_s28  ;;  %817 = vrot.lane.b32.xlu1 %v811_v53, %s2355_s18 }
 0x29d   : > { %827 = vrot.lane.b32.xlu1 %v811_v53, %s2356_s22 }
 0x2a0   : > { %v832_v55 = vld [vmem:[#allocation4] sm:$0xf] }
 0x2a1   : > { %1947 = vmatmul.mubr.msk.bf16.vlgmr.msra.gmra.mrb[12].mxu1 %vm840_vm3, %v832_v55 }
 0x2a2   : > { %1958 = vmatprep.mubr.msk.bf16.mxu1 %vm2353_vm1, %v2352_v13 }
 0x2f9   : > { %v693_v56 = vpop.permute.xlu1 %692  ;;  %v677_v57 = vpop.permute.xlu0 %676 }
 0x2fa   : > { %698 = vst.msk [vmem:[#allocation2 + $0x8] sm:$0xf] %vm670_vm2, %v693_v56  ;;  %682 = vst.msk [vmem:[#allocation2 + $0x4] sm:$0xf] %vm670_vm2, %v677_v57 }
 0x2fd   : > { %v706_v58 = vpop.permute.xlu1 %705 }
 0x2fe   : > { %711 = vst.msk [vmem:[#allocation2 + $0xc] sm:$0xf] %vm670_vm2, %v706_v58 }
 0x301   : > { %v837_v59 = vld [vmem:[#allocation2 + $0x4] sm:$0xf]  ;;  %v838_v60 = vld [vmem:[#allocation2 + $0x8] sm:$0xf] }
 0x302   : > { %v891_v61 = vsel %vm840_vm3, %v837_v59, 0  ;;  %v937_v62 = vsel %vm840_vm3, %v838_v60, 0 }
 0x303   : > { %1951 = vmatpush3.bf16.xpose.msra.mxu0 %v891_v61  ;;  %1957 = vmatpush3.bf16.xpose.msra.mxu1 %v937_v62 }
 0x304   : > { %1962 = vmatprep.subr.bf16.mxu0 %v2352_v13  ;;  %1968 = vmatprep.subr.bf16.mxu1 %v2352_v13 }
 0x305   : > { %v839_v3 = vld [vmem:[#allocation2 + $0xc] sm:$0xf] }
 0x306   : > { %v983_v7 = vsel %vm840_vm3, %v839_v3, 0 }
 0x30b   : > { %v823_v63 = vpop.permute.xlu0 %822  ;;  %v818_v1 = vpop.permute.xlu1 %817 }
 0x30c   : > { %826 = vst.msk [vmem:[#allocation4 + $0x8] sm:$0xf] %vm670_vm2, %v823_v63  ;;  %821 = vst.msk [vmem:[#allocation4 + $0x4] sm:$0xf] %vm670_vm2, %v818_v1  ;;  %v1266_v1 = vld [vmem:[%s2863_s6] sm:$0xf] }
 0x30f   : > { %v828_v2 = vpop.permute.xlu1 %827 }
 0x310   : > { %831 = vst.msk [vmem:[#allocation4 + $0xc] sm:$0xf] %vm670_vm2, %v828_v2 }
 0x313   : > { %v833_v5 = vld [vmem:[#allocation4 + $0x4] sm:$0xf]  ;;  %v834_v6 = vld [vmem:[#allocation4 + $0x8] sm:$0xf] }
 0x314   : > { %1953 = vmatmul.mubr.msk.bf16.vlgmr.msra.gmra.mrb[0].mxu0 %vm840_vm3, %v833_v5  ;;  %1959 = vmatmul.mubr.msk.bf16.vlgmr.msra.gmra.mrb[16].mxu1 %vm840_vm3, %v834_v6 }
 0x315   : > { %1963 = vmatpush3.bf16.xpose.msra.mxu0 %v983_v7  ;;  %1969 = vmatpush3.bf16.msra.mxu1 %v1082_v8  ;;  %v1274_v7 = vsel %vm1080_vm4, %v1266_v1, 0 }
 0x316   : > { %1964 = vmatprep.mubr.msk.bf16.mxu0 %vm2353_vm1, %v2352_v13  ;;  %1970 = vmatprep.mubr.msk.bf16.mxu1 %vm2353_vm1, %v2352_v13 }
 0x317   : > { %1974 = vmatprep.subr.bf16.mxu0 %v2352_v13  ;;  %1980 = vmatprep.subr.bf16.mxu1 %v2352_v13  ;;  %v835_v9 = vld [vmem:[#allocation4 + $0xc] sm:$0xf] }
 0x31c   : > { %1965 = vmatmul.mubr.msk.bf16.vlgmr.msra.gmra.mrb[4].mxu0 %vm840_vm3, %v835_v9 }
 0x31d   : > { %1976 = vmatprep.mubr.msk.bf16.mxu0 %vm2353_vm1, %v2352_v13 }
 0x374   : > { %v881_v10 = vpop.f32.mrb[12].mxu1 }
 0x375   : > { %v1948_v11 = vpop.f32.mrb[13].mxu1  ;;  %v1025_v12 = vsel %vm840_vm3, %v881_v10, -inf }
 0x376   : > { %1026 = vmax.xlane.f32.xlu0 %v1025_v12  ;;  %v884_v14 = vpop.f32.mrb[14].mxu1 }
 0x377   : > { %v1949_v15 = vpop.f32.mrb[15].mxu1 }
 0x3e7   : > { %v927_v16 = vpop.f32.mrb[0].mxu0  ;;  %v973_v17 = vpop.f32.mrb[16].mxu1 }
 0x3e8   : > { %v1954_v18 = vpop.f32.mrb[1].mxu0  ;;  %v1960_v19 = vpop.f32.mrb[17].mxu1  ;;  %v1028_v20 = vsel %vm840_vm3, %v927_v16, -inf  ;;  %v1031_v21 = vsel %vm840_vm3, %v973_v17, -inf }
 0x3e9   : > { %1029 = vmax.xlane.f32.xlu1 %v1028_v20  ;;  %v930_v22 = vpop.f32.mrb[2].mxu0  ;;  %1032 = vmax.xlane.f32.xlu0 %v1031_v21  ;;  %v976_v23 = vpop.f32.mrb[18].mxu1  ;;  %v1268_v18 = vld [vmem:[%s2863_s6 + $0x8] sm:$0xf] }
 0x3ea   : > { %v1955_v24 = vpop.f32.mrb[3].mxu0  ;;  %v1961_v25 = vpop.f32.mrb[19].mxu1  ;;  %v1366_v22 = vsel %vm1080_vm4, %v1268_v18, 0 }
 0x3eb   : > { %v1269_v25 = vld [vmem:[%s2863_s6 + $0xc] sm:$0xf] }
 0x3ef   : > { %v1019_v26 = vpop.f32.mrb[4].mxu0 }
 0x3f0   : > { %v1966_v27 = vpop.f32.mrb[5].mxu0  ;;  %v1034_v28 = vsel %vm840_vm3, %v1019_v26, -inf }
 0x3f1   : > { %v1022_v29 = vpop.f32.mrb[6].mxu0  ;;  %1035 = vmax.xlane.f32.xlu0 %v1034_v28 }
 0x3f2   : > { %v1967_v30 = vpop.f32.mrb[7].mxu0 }
 0x403   : > { %v1027_v31 = vpop.xlane.xlu0 %1026 }
 0x404   : > { %v1037_v32 = vsub.f32 %v881_v10, %v1027_v31 }
 0x406   : > { %v1041_v33 = vmul.f32 1.442695, %v1037_v32 }
 0x408   : > { %2155 = vpow2.f32 %v1041_v33  ;;  %v1412_v33 = vsel %vm1080_vm4, %v1269_v25, 0  ;;  %v2145_v25 = vld [vmem:[%s2869_s12 + $0x10] sm:$0xff]  }
 0x412   : > { %v2156_v34 = vpop.eup %2155 }
 0x413   : > { %v1049_v35 = vsel %vm840_vm3, %v2156_v34, 0.0 }
 0x414   : > { %1050 = vadd.xlane.f32.xlu0 %v1049_v35 }
 0x476   : > { %v1030_v36 = vpop.xlane.xlu1 %1029  ;;  %v1033_v37 = vpop.xlane.xlu0 %1032 }
 0x477   : > { %v1038_v38 = vsub.f32 %v927_v16, %v1030_v36  ;;  %v1039_v39 = vsub.f32 %v973_v17, %v1033_v37  ;;  %v1267_v16 = vld [vmem:[%s2863_s6 + $0x4] sm:$0xf] }
 0x478   : > { %v1320_v17 = vsel %vm1080_vm4, %v1267_v16, 0 }
 0x479   : > { %v1043_v40 = vmul.f32 1.442695, %v1038_v38  ;;  %v1045_v41 = vmul.f32 1.442695, %v1039_v39 }
 0x47b   : > { %2157 = vpow2.f32 %v1043_v40 }
 0x47c   : > { %2159 = vpow2.f32 %v1045_v41 }
 0x47e   : > { %v1036_v47 = vpop.xlane.xlu0 %1035 }
 0x47f   : > { %v1040_v49 = vsub.f32 %v1019_v26, %v1036_v47 }
 0x481   : > { %v1047_v50 = vmul.f32 1.442695, %v1040_v49 }
 0x485   : > { %v2158_v42 = vpop.eup %2157 }
 0x486   : > { %v2160_v44 = vpop.eup %2159  ;;  %v1052_v45 = vsel %vm840_vm3, %v2158_v42, 0.0 }
 0x487   : > { %1053 = vadd.xlane.f32.xlu1 %v1052_v45  ;;  %v1055_v46 = vsel %vm840_vm3, %v2160_v44, 0.0 }
 0x488   : > { %1056 = vadd.xlane.f32.xlu0 %v1055_v46 }
 0x498   : > { %699 = vrot.lane.b32.xlu1 %v2644_v43, %s2354_s28  ;;  %s2267_s28 = scalar_lea.vmem %s2266_s15, 256 }
 0x49e   : > { %686 = vrot.lane.b32.xlu0 %v2644_v43, %s2355_s18  ;;  %s508_s18 = sand.u32 1, %s2331_s30  }
 0x49f   : > { %s1691_s16 = scalar_lea.sflag [#allocation7], %s508_s18 }
 0x4a1   : > { %v1051_v48 = vpop.xlane.xlu0 %1050 }
 0x4a2   : > { %2161 = vrcp.f32 %v1051_v48 }
 0x4a3   : > { %2163 = vpow2.f32 %v1047_v50 }
 0x4ac   : > { %v2162_v51 = vpop.eup %2161 }
 0x4ad   : > { %v1065_v52 = vmul.f32 %v2162_v51, %v2156_v34  ;;  %v2164_v54 = vpop.eup %2163 }
 0x4ae   : > { %v1058_v55 = vsel %vm840_vm3, %v2164_v54, 0.0 }
 0x4af   : > { %v1069_v53 = vpack.c.bf16 %v1065_v52, %v1065_v52 }
 0x4b1   : > { %1971 = vmatmul.mubr.msk.bf16.vlgmr.msra.gmra.mrb[20].mxu1 %vm840_vm3, %v1069_v53 }
 0x4b2   : > { %1982 = vmatprep.mubr.msk.bf16.mxu1 %vm2353_vm1, %v2352_v13 }
 0x4bc   : > { %1059 = vadd.xlane.f32.xlu1 %v1058_v55 }
 0x4cd   : > { %712 = vrot.lane.b32.xlu1 %v2644_v43, %s2356_s22  ;;  %s1823_s22 = sshll.u32 %s508_s18, 3 }
 0x4ce   : > { %s510_s17 = scalar_lea.vmem [#allocation11], %s1823_s22 }
 0x4cf   : > { %s1705_s23 = sshll.u32 %s510_s17, 4  ;;  %s2811_s23 = int_to_ptr.vmem [resolvable:$true] %s1705_s23 }
 0x4d0   : > { %s2261_s20 = scalar_lea.vmem %s2811_s23, 128  ;;  %p2268_p11 = scmp.lt.s32.totalorder %s2811_s23, %s2266_s15 }
 0x4d1   : > { %p2262_p13 = scmp.ne.s32.totalorder %s2811_s23, %s2261_s20  ;;  %p2269_p3 = scmp.lt.s32.totalorder %s2267_s28, %s2261_s20 }
 0x4d3   : > { %p2263_p8 = pnand %p2262_p13, %p2907_p4  ;;  %p2270_p5 = por %p2269_p3, %p2268_p11 }
 0x4d5   : > { %p2264_p10 = pneg %p2263_p8 }
 0x4d7   : > { %p2271_p6 = pnand %p2270_p5, %p2264_p10 }
 0x514   : > { %v1054_v56 = vpop.xlane.xlu1 %1053 }
 0x515   : > { %2165 = vrcp.f32 %v1054_v56  ;;  %v1057_v57 = vpop.xlane.xlu0 %1056 }
 0x516   : > { %2167 = vrcp.f32 %v1057_v57 }
 0x518   : > { %v700_v58 = vpop.permute.xlu1 %699 }
 0x519   : > { %704 = vst.msk [vmem:[#allocation3 + $0x8] sm:$0xf] %vm670_vm2, %v700_v58  ;;  %v687_v59 = vpop.permute.xlu0 %686 }
 0x51a   : > { %691 = vst.msk [vmem:[#allocation3 + $0x4] sm:$0xf] %vm670_vm2, %v687_v59 }
 0x51f   : > { %v2166_v60 = vpop.eup %2165 }
 0x520   : > { %v2168_v61 = vpop.eup %2167  ;;  %v1066_v62 = vmul.f32 %v2166_v60, %v2158_v42  ;;  %v1075_v63 = vld [vmem:[#allocation3 + $0x8] sm:$0xf] }
 0x521   : > { %v1067_v2 = vmul.f32 %v2168_v61, %v2160_v44  ;;  %v1074_v43 = vld [vmem:[#allocation3 + $0x4] sm:$0xf]  ;;  %v1174_v3 = vsel %vm1080_vm4, %v1075_v63, 0 }
 0x522   : > { %v1128_v4 = vsel %vm1080_vm4, %v1074_v43, 0  ;;  %1981 = vmatpush3.bf16.msra.mxu1 %v1174_v3  ;;  %v1070_v5 = vpack.c.bf16 %v1066_v62, %v1066_v62  ;;  %v1849_v62 = vld [vmem:[#allocation5] ss:$0 sm:$0xff] }
 0x523   : > { %1975 = vmatpush3.bf16.msra.mxu0 %v1128_v4  ;;  %v1071_v6 = vpack.c.bf16 %v1067_v2, %v1067_v2  ;;  %1992 = vmatprep.subr.bf16.mxu1 %v2352_v13 }
 0x524   : > { %1986 = vmatprep.subr.bf16.mxu0 %v2352_v13 }
 0x525   : > { %1983 = vmatmul.mubr.msk.bf16.vlgmr.msra.gmra.mrb[24].mxu1 %vm840_vm3, %v1071_v6 }
 0x526   : > { %1977 = vmatmul.mubr.msk.bf16.vlgmr.msra.gmra.mrb[8].mxu0 %vm840_vm3, %v1070_v5  ;;  %1993 = vmatpush3.bf16.msra.mxu1 %v1274_v7 }
 0x527   : > { %1988 = vmatprep.mubr.msk.bf16.mxu0 %vm2353_vm1, %v2352_v13  ;;  %1994 = vmatprep.mubr.msk.bf16.mxu1 %vm2353_vm1, %v2352_v13 }
 0x528   : > { %2004 = vmatprep.subr.bf16.mxu1 %v2352_v13 }
 0x549   : > { %v1060_v8 = vpop.xlane.xlu1 %1059 }
 0x54a   : > { %2169 = vrcp.f32 %v1060_v8 }
 0x54d   : > { %v713_v9 = vpop.permute.xlu1 %712 }
 0x54e   : > { %717 = vst.msk [vmem:[#allocation3 + $0xc] sm:$0xf] %vm670_vm2, %v713_v9 }
 0x554   : > { %v2170_v10 = vpop.eup %2169 }
 0x555   : > { %v1068_v11 = vmul.f32 %v2170_v10, %v2164_v54  ;;  %v1076_v12 = vld [vmem:[#allocation3 + $0xc] sm:$0xf] }
 0x556   : > { %v1220_v14 = vsel %vm1080_vm4, %v1076_v12, 0 }
 0x557   : > { %1987 = vmatpush3.bf16.msra.mxu0 %v1220_v14  ;;  %v1072_v15 = vpack.c.bf16 %v1068_v11, %v1068_v11  ;;  %v2141_v11 = vld [vmem:[%s2867_s10] sm:$0xff]  }
 0x558   : > { %1998 = vmatprep.subr.bf16.mxu0 %v2352_v13 }
 0x55a   : > { %1989 = vmatmul.mubr.msk.bf16.vlgmr.msra.gmra.mrb[12].mxu0 %vm840_vm3, %v1072_v15 }
 0x55b   : > { %2000 = vmatprep.mubr.msk.bf16.mxu0 %vm2353_vm1, %v2352_v13  ;;  %1999 = vmatpush3.bf16.msra.mxu0 %v1320_v17  ;;  %v1850_v17 = vld [vmem:[#allocation8] ss:$0 sm:$0xff] }
 0x55c   : > { %2010 = vmatprep.subr.bf16.mxu0 %v2352_v13 }
 0x584   : > { %v1118_v19 = vpop.f32.mrb[20].mxu1 }
 0x585   : > { %v1262_v20 = vpack.c.bf16 %v1118_v19, %v1118_v19  ;;  %v1972_v21 = vpop.f32.mrb[21].mxu1  ;;  %v1851_v19 = vld [vmem:[#allocation10] ss:$0 sm:$0xff] }
 0x586   : > { %v1121_v23 = vpop.f32.mrb[22].mxu1 }
 0x587   : > { %v1973_v24 = vpop.f32.mrb[23].mxu1  ;;  %1995 = vmatmul.mubr.msk.bf16.vlgmr.msra.gmra.mrb[28].mxu1 %vm840_vm3, %v1262_v20  ;;  %v2143_v23 = vld [vmem:[%s2869_s12] sm:$0xff]  }
 0x588   : > { %2005 = vmatpush3.bf16.msra.mxu1 %v1366_v22  ;;  %2006 = vmatprep.mubr.msk.bf16.mxu1 %vm2353_vm1, %v2352_v13  ;;  %v2144_v24 = vld [vmem:[%s2869_s12 + $0x8] sm:$0xff]  }
 0x589   : > { %2016 = vmatprep.subr.bf16.mxu1 %v2352_v13 }
 0x5f8   : > { %v1210_v26 = vpop.f32.mrb[24].mxu1 }
 0x5f9   : > { %v1164_v27 = vpop.f32.mrb[8].mxu0  ;;  %v1264_v28 = vpack.c.bf16 %v1210_v26, %v1210_v26  ;;  %v1984_v29 = vpop.f32.mrb[25].mxu1  ;;  %v2146_v26 = vld [vmem:[%s2869_s12 + $0x18] sm:$0xff]  }
 0x5fa   : > { %v1263_v30 = vpack.c.bf16 %v1164_v27, %v1164_v27  ;;  %v1978_v31 = vpop.f32.mrb[9].mxu0  ;;  %v1213_v32 = vpop.f32.mrb[26].mxu1  ;;  %v2147_v27 = vld [vmem:[%s2869_s12 + $0x20] sm:$0xff]   ;;  %v2149_v29 = vld [vmem:[%s2869_s12 + $0x30] sm:$0xff]  }
 0x5fb   : > { %v1167_v34 = vpop.f32.mrb[10].mxu0  ;;  %v1985_v35 = vpop.f32.mrb[27].mxu1  ;;  %2007 = vmatmul.mubr.msk.bf16.vlgmr.msra.gmra.mrb[32].mxu1 %vm840_vm3, %v1264_v28  ;;  %v2148_v28 = vld [vmem:[%s2869_s12 + $0x28] sm:$0xff]   ;;  %v1852_v31 = vld [vmem:[%s2868_s11] ss:$0 sm:$0xff] }
 0x5fc   : > { %v1979_v36 = vpop.f32.mrb[11].mxu0  ;;  %2001 = vmatmul.mubr.msk.bf16.vlgmr.msra.gmra.mrb[16].mxu0 %vm840_vm3, %v1263_v30  ;;  %2020 = vmatprep.mubr.msk.bf16.mxu1 %vm2353_vm1, %v2352_v13  ;;  %v2150_v30 = vld [vmem:[%s2869_s12 + $0x38] sm:$0xff]  }
 0x5fd   : > { %2011 = vmatpush3.bf16.msra.mxu0 %v1412_v33  ;;  %2012 = vmatprep.mubr.msk.bf16.mxu0 %vm2353_vm1, %v2352_v13 }
 0x5fe   : > { %2024 = vmatprep.subr.bf16.mxu0 %v2352_v13  ;;  %2017 = vmatpush3.bf16.msra.mxu1 %v2141_v11 }
 0x5ff   : > { %2018 = vmatprep.subr.bf16.mxu1 %v2352_v13 }
 0x62d   : > { %v1256_v37 = vpop.f32.mrb[12].mxu0 }
 0x62e   : > { %v1265_v38 = vpack.c.bf16 %v1256_v37, %v1256_v37  ;;  %v1990_v39 = vpop.f32.mrb[13].mxu0 }
 0x62f   : > { %v1259_v40 = vpop.f32.mrb[14].mxu0 }
 0x630   : > { %v1991_v41 = vpop.f32.mrb[15].mxu0  ;;  %2013 = vmatmul.mubr.msk.bf16.vlgmr.msra.gmra.mrb[20].mxu0 %vm840_vm3, %v1265_v38 }
 0x631   : > { %2040 = vmatprep.mubr.msk.bf16.mxu0 %vm2353_vm1, %v2352_v13  ;;  %2025 = vmatpush3.bf16.msra.mxu0 %v2143_v23 }
 0x632   : > { %2026 = vmatprep.subr.bf16.mxu0 %v2352_v13 }
 0x635   : > { %2027 = vmatpush3.bf16.msra.mxu0 %v2144_v24 }
 0x636   : > { %2028 = vmatprep.subr.bf16.mxu0 %v2352_v13 }
 0x639   : > { %2029 = vmatpush3.bf16.msra.mxu0 %v2145_v25 }
 0x63a   : > { %2030 = vmatprep.subr.bf16.mxu0 %v2352_v13 }
 0x63d   : > { %2031 = vmatpush3.bf16.msra.mxu0 %v2146_v26 }
 0x63e   : > { %2032 = vmatprep.subr.bf16.mxu0 %v2352_v13 }
 0x641   : > { %2033 = vmatpush3.bf16.msra.mxu0 %v2147_v27 }
 0x642   : > { %2034 = vmatprep.subr.bf16.mxu0 %v2352_v13 }
 0x645   : > { %2035 = vmatpush3.bf16.msra.mxu0 %v2148_v28 }
 0x646   : > { %2036 = vmatprep.subr.bf16.mxu0 %v2352_v13 }
 0x649   : > { %2037 = vmatpush3.bf16.msra.mxu0 %v2149_v29 }
 0x64a   : > { %2038 = vmatprep.subr.bf16.mxu0 %v2352_v13 }
 0x64d   : > { %2039 = vmatpush3.bf16.msra.mxu0 %v2150_v30 }
 0x65a   : > { %v1310_v42 = vpop.f32.mrb[28].mxu1 }
 0x65b   : > { %v1996_v44 = vpop.f32.mrb[29].mxu1  ;;  %v1454_v50 = vsel %vm523_vm0, %v1310_v42, 0.0 }
 0x65c   : > { %v1313_v45 = vpop.f32.mrb[30].mxu1 }
 0x65d   : > { %v1997_v46 = vpop.f32.mrb[31].mxu1 }
 0x6ce   : > { %v1402_v47 = vpop.f32.mrb[32].mxu1 }
 0x6cf   : > { %v1356_v48 = vpop.f32.mrb[16].mxu0  ;;  %v2008_v49 = vpop.f32.mrb[33].mxu1  ;;  %v1457_v57 = vsel %vm523_vm0, %v1402_v47, 0.0 }
 0x6d0   : > { %v1455_v51 = vsel %vm523_vm0, %v1356_v48, 0.0  ;;  %v2002_v52 = vpop.f32.mrb[17].mxu0  ;;  %v1405_v53 = vpop.f32.mrb[34].mxu1  ;;  %v1857_v48 = vld [vmem:[%s2870_s13] ss:$0 sm:$0xff] }
 0x6d1   : > { %v1456_v54 = vadd.f32 %v1455_v51, %v1454_v50  ;;  %v1359_v55 = vpop.f32.mrb[18].mxu0  ;;  %v2009_v56 = vpop.f32.mrb[35].mxu1 }
 0x6d2   : > { %v2003_v58 = vpop.f32.mrb[19].mxu0 }
 0x6d3   : > { %v1458_v59 = vadd.f32 %v1457_v57, %v1456_v54 }
 0x703   : > { %v1448_v60 = vpop.f32.mrb[20].mxu0 }
 0x704   : > { %v1459_v61 = vsel %vm523_vm0, %v1448_v60, 0.0  ;;  %v2014_v63 = vpop.f32.mrb[21].mxu0 }
 0x705   : > { %v1460_v1 = vadd.f32 %v1459_v61, %v1458_v59  ;;  %v1451_v2 = vpop.f32.mrb[22].mxu0 }
 0x706   : > { %v2015_v43 = vpop.f32.mrb[23].mxu0 }
 0x707   : > { %v1468_v3 = vadd.f32 %v1849_v62, %v1460_v1 }
 0x709   : > { %v2752_v4 = vadd.f32 %v1468_v3, %v2587_v0  ;;  %v2142_v0 = vld [vmem:[%s2867_s10 + $0x8] sm:$0xff]  }
 0x70a   : > { %2019 = vmatpush3.bf16.msra.mxu1 %v2142_v0 }
 0x70b   : > { %v1472_v5 = vsel %vm523_vm0, %v2752_v4, 0.0 }
 0x70c   : > { %1473 = vadd.xlane.f32.xlu1 %v1472_v5 }
 0x799   : > { %v1474_v6 = vpop.xlane.xlu1 %1473 }
 0x79a   : > { %v1475_v7 = vmul.f32 0.03125, %v1474_v6 }
 0x79c   : > { %v1476_v8 = vsub.f32 %v2752_v4, %v1475_v7 }
 0x79e   : > { %v1477_v9 = vmul.f32 %v1476_v8, %v1476_v8 }
 0x7a0   : > { %v1478_v10 = vsel %vm523_vm0, %v1477_v9, 0.0 }
 0x7a1   : > { %1479 = vadd.xlane.f32.xlu0 %v1478_v10 }
 0x82e   : > { %v1480_v12 = vpop.xlane.xlu0 %1479 }
 0x82f   : > { %v1481_v14 = vmul.f32 0.03125, %v1480_v12 }
 0x831   : > { %v1482_v15 = vadd.f32 1e-05, %v1481_v14 }
 0x833   : > { %2171 = vrsqrt.f32 %v1482_v15 }
 0x83d   : > { %v2172_v16 = vpop.eup %2171 }
 0x83e   : > { %v1484_v18 = vmul.f32 %v2172_v16, %v1476_v8 }
 0x840   : > { %v1491_v20 = vmul.f32 %v1850_v17, %v1484_v18 }
 0x842   : > { %v1498_v21 = vadd.f32 %v1851_v19, %v1491_v20 }
 0x844   : > { %v1499_v22 = vpack.c.bf16 %v1498_v21, %v1498_v21 }
 0x846   : > { %2021 = vmatmul.mubr.msk.bf16.vlgmr.msra.gmra.mrb[36].mxu1 %vm523_vm0, %v1499_v22 }
 0x919   : > { %v1560_v32 = vpop.f32.mrb[36].mxu1 }
 0x91a   : > { %v1561_v33 = vadd.f32 %v1852_v31, %v1560_v32  ;;  %v2022_v34 = vpop.f32.mrb[37].mxu1 }
 0x91b   : > { %v1563_v35 = vpop.f32.mrb[38].mxu1 }
 0x91c   : > { %v1566_v36 = vmin.f32 %v1561_v33, 20.0  ;;  %v2023_v37 = vpop.f32.mrb[39].mxu1 }
 0x91e   : > { %v1567_v38 = vmul.f32 1.442695, %v1566_v36 }
 0x920   : > { %2173 = vpow2.f32 %v1567_v38 }
 0x92a   : > { %v2174_v13 = vpop.eup %2173 }
 0x92b   : > { %v1569_v39 = vadd.f32 1.0, %v2174_v13 }
 0x92d   : > { %v1570_v40 = vmul.f32 %v1569_v39, %v1569_v39 }
 0x92f   : > { %v1572_v41 = vadd.f32 1.0, %v1570_v40  ;;  %v1856_v42 = vadd.f32 -1.0, %v1570_v40 }
 0x931   : > { %2175 = vrcp.f32 %v1572_v41 }
 0x93b   : > { %v2176_v44 = vpop.eup %2175 }
 0x93c   : > { %v1574_v45 = vmul.f32 %v2176_v44, %v1856_v42 }
 0x93e   : > { %v1575_v46 = vmul.f32 %v1574_v45, %v1561_v33 }
 0x940   : > { %v1576_v47 = vpack.c.bf16 %v1575_v46, %v1575_v46 }
 0x942   : > { %2041 = vmatmul.mubr.bf16.vlgmr.msra.gmra.mrb[24].mxu0 %v1576_v47 }
 0xa15   : > { %v1682_v49 = vpop.f32.mrb[24].mxu0 }
 0xa16   : > { %v1683_v50 = vadd.f32 %v1857_v48, %v1682_v49  ;;  %v2042_v51 = vpop.f32.mrb[25].mxu0 }
 0xa17   : > { %v1685_v52 = vpop.f32.mrb[26].mxu0 }
 0xa18   : > { %v1688_v53 = vadd.f32 %v1683_v50, %v2752_v4  ;;  %v2043_v54 = vpop.f32.mrb[27].mxu0 }
 0xa1a   : > { %1689 = vst.msk [vmem:[%s510_s17] sm:$0xff] %vm523_vm0, %v1688_v53 }
 0xa1b   : > { %2274 = shalt.err (!%p2271_p6)
}
 0xa1c   : > { %s2275_s18 = scalar_lea.hbm %s2809_s21, 128  ;;  %s2279_s29 = scalar_lea.hbm %s2906_s8, 256 }
 0xa1d   : > { %p2276_p7 = scmp.ne.s32.totalorder %s2809_s21, %s2275_s18  ;;  %p2280_p0 = scmp.lt.u32.totalorder %s2809_s21, %s2906_s8 }
 0xa1e   : > { %p2281_p2 = scmp.lt.u32.totalorder %s2279_s29, %s2275_s18  ;;  %p2283_p13 = scmp.lt.u32.totalorder %s2275_s18, %s2809_s21 }
 0xa1f   : > { %p2277_p9 = pnand %p2276_p7, %p2907_p4 }
 0xa20   : > { %p2282_p1 = por %p2281_p2, %p2280_p0 }
 0xa21   : > { %p2278_p12 = pneg %p2277_p9 }
 0xa22   : > { %p2284_p8 = por %p2283_p13, %p2282_p1 }
 0xa24   : > { %p2285_p10 = pnand %p2284_p8, %p2278_p12 }
 0xa26   : > { %2288 = shalt.err (!%p2285_p10)
}
 0xa27   : > { %2056 = dma.vmem_to_hbm [thread:$0]  (%p2907_p4), %s2811_s23, 128, %s2809_s21, %s1691_s16  }
 0xa28 PF: > { %s2908_s25 = sld [smem:[#allocation18_spill]]  ;;  %s2909_s19 = sld [smem:[#allocation15_spill]] }
 0xa29   : > { %s2910_s20 = sld [smem:[#allocation21_spill]] }
 0xa2e   : > { %p2078_p11 = scmp.ge.s32.totalorder %s2908_s25, 2  ;;  %s1717_s27 = sand.u32 1, %s2909_s19  }
 0xa2f   : > { %p2911_p3 = scmp.ne.s32.totalorder %s2910_s20, 0  ;;  %s1718_s15 = scalar_lea.sflag [#allocation7], %s1717_s27 }
 0xa31   : > { %p2069_p5 = pnand %p2078_p11, %p2911_p3 }
 0xa33   : > { %2322 = dma.done.wait (!%p2069_p5), %s1718_s15, 128  }
 0xa34   : > { %2324 = vsyncadd (!%p2069_p5), %s1718_s15, 4294967168  ;;  %s29_s18 = sadd.s32 1, %s2908_s25   ;;  %s2912_s28 = sld [smem:[#allocation16_spill]] }
 0xa35   : > { %p26_p6 = scmp.ge.s32.totalorder %s29_s18, 4   ;;  %s2913_s15 = sld [smem:[#allocation22_spill]] }
 0xa36   : > { %s2914_s16 = sld [smem:[#allocation17_spill]]  ;;  %s2915_s17 = sld [smem:[#allocation19_spill]] }
 0xa37   : > { %s2916_s29 = smov %s2331_s30  ;;  %28 = sbr.rel (!%p26_p6) target bundleno = 9 (0x9), region = 138 }
 0xa3a   : > { %s2917_s30 = smov %s2912_s28 }
 0xa3e   :  { %1723 = vsyncpa [#allocation6], 1 }
 0xa3f   :  { %1725 = vsyncpa [#allocation6 + $0x1], 1 }
 0xa40   :  { %1726 = vsyncpa [#allocation9], 1 }
 0xa41   :  { %1727 = vsyncpa [#allocation7], 1 }
 0xa42   :  { %1729 = vsyncpa [#allocation7 + $0x1], 1 }

</bundles_post_ra>
